<compile_context>
chip_gen: v5e
topology: v5e:2x2
jax: 0.10.0
libtpu: 0.0.40
codegen_flags: <defaults>
</compile_context>

<pallas_src>
import math
from functools import partial

import jax
import jax.numpy as jnp
from jax import lax
from jax.experimental import pallas as pl
from jax.experimental.pallas import tpu as pltpu


# ----------------------------- Pallas kernel -----------------------------

def _pe_kernel(off_ref, msk_ref, w_ref, b_ref, out_ref, *, max_rel):
    """Fused clip + one-hot + Linear for one row block.

    off_ref, msk_ref : [nb, 1] int32
    w_ref            : [2*max_rel + 2, D] float32
    b_ref            : [1, D] float32
    out_ref          : [nb, D] float32
    """
    nb = off_ref.shape[0]
    nclass = w_ref.shape[0]                       # 2*max_rel + 2

    off = off_ref[...]                            # [nb, 1] int32
    msk = msk_ref[...]                            # [nb, 1] int32 (0/1)

    d = jnp.clip(off + max_rel, 0, 2 * max_rel) * msk \
        + (1 - msk) * (2 * max_rel + 1)           # [nb, 1] int32 in [0, nclass-1]

    # One-hot built entirely in VMEM/vregs (never written to HBM).
    cls = lax.broadcasted_iota(jnp.int32, (nb, nclass), 1)
    onehot = (cls == d).astype(jnp.float32)       # [nb, nclass]

    out_ref[...] = jnp.dot(onehot, w_ref[...],
                           preferred_element_type=jnp.float32) + b_ref[...]


def _pad_and_block(n, target=512):
    """Pick a row padding + block size: block is a multiple of 8 that divides
    the padded row count, grid has >= 2 steps (v7x megacore), block <= target."""
    if n <= 2 * target:
        n_pad = ((n + 15) // 16) * 16             # multiple of 16
        nb = max(n_pad // 2, 8)                   # multiple of 8, 2 grid steps
    else:
        nb = target                               # 512-row blocks
        n_pad = ((n + nb - 1) // nb) * nb
    return n_pad, nb


def positional_encodings(offset, mask, w, b, *, max_relative_feature=32):
    """Pallas equivalent of PositionalEncodings.forward(offset, mask).

    offset, mask : integer arrays of identical shape [...]
    w            : [2*max_relative_feature + 2, num_embeddings] float32
    b            : [num_embeddings] float32
    returns      : [..., num_embeddings] float32
    """
    nclass = 2 * max_relative_feature + 2
    assert w.shape[0] == nclass, "weight first dim must be 2*max_rel + 2"
    dout = w.shape[1]

    orig_shape = offset.shape
    n = math.prod(orig_shape)

    off_flat = offset.reshape(n).astype(jnp.int32)
    msk_flat = mask.reshape(n).astype(jnp.int32)

    n_pad, nb = _pad_and_block(n)
    if n_pad != n:                                # padded rows: mask=0 -> class 65, sliced off below
        off_flat = jnp.pad(off_flat, (0, n_pad - n))
        msk_flat = jnp.pad(msk_flat, (0, n_pad - n))

    off2 = off_flat.reshape(n_pad, 1)
    msk2 = msk_flat.reshape(n_pad, 1)

    kernel = partial(_pe_kernel, max_rel=max_relative_feature)
    out = pl.pallas_call(
        kernel,
        out_shape=jax.ShapeDtypeStruct((n_pad, dout), jnp.float32),
        grid=(n_pad // nb,),
        in_specs=[
            pl.BlockSpec((nb, 1), lambda i: (i, 0)),        # offset rows
            pl.BlockSpec((nb, 1), lambda i: (i, 0)),        # mask rows
            pl.BlockSpec((nclass, dout), lambda i: (0, 0)),  # weight (VMEM-resident)
            pl.BlockSpec((1, dout), lambda i: (0, 0)),       # bias
        ],
        out_specs=pl.BlockSpec((nb, dout), lambda i: (i, 0)),
        compiler_params=pltpu.CompilerParams(
            dimension_semantics=("parallel",)),
    )(off2, msk2, w, b.reshape(1, dout))

    return out[:n].reshape(*orig_shape, dout)


# ----------------------------- demo / check -----------------------------

if __name__ == "__main__":
    key = jax.random.PRNGKey(0)
    k_off, k_msk, k_w, k_b = jax.random.split(key, 4)

    # Shapes consistent with RNAMPNN usage: offset/mask are [B, L, K] int.
    B, L, K = 2, 16, 30
    NUM_EMB = 16
    MAX_REL = 32
    NCLASS = 2 * MAX_REL + 2                      # 66

    offset = jax.random.randint(k_off, (B, L, K), -48, 48, dtype=jnp.int32)
    mask = jax.random.bernoulli(k_msk, 0.8, (B, L, K)).astype(jnp.int32)

    # nn.Linear(66, NUM_EMB) default init (uniform +/- 1/sqrt(fan_in)),
    # stored as [in, out] so the kernel computes x @ W + b.
    bound = 1.0 / math.sqrt(NCLASS)
    w = jax.random.uniform(k_w, (NCLASS, NUM_EMB), jnp.float32, -bound, bound)
    b = jax.random.uniform(k_b, (NUM_EMB,), jnp.float32, -bound, bound)

    E = positional_encodings(offset, mask, w, b, max_relative_feature=MAX_REL)
    E = jax.block_until_ready(E)

    # Pure-JAX reference of the PyTorch forward.
    d_ref = jnp.clip(offset + MAX_REL, 0, 2 * MAX_REL) * mask \
        + (1 - mask) * (2 * MAX_REL + 1)
    E_ref = jax.nn.one_hot(d_ref, NCLASS, dtype=jnp.float32) @ w + b

    assert E.shape == (B, L, K, NUM_EMB)
    assert bool(jnp.all(jnp.isfinite(E)))
    assert bool(jnp.allclose(E, E_ref, atol=1e-5, rtol=1e-5))
    print("KERNEL_OK")
</pallas_src>

<mosaic_0001>
module attributes {stable_mosaic.version = 11 : i64} {
  func.func @_pe_kernel(%arg0: i32, %arg1: memref<480x1xi32, #tpu.memory_space<vmem>>, %arg2: memref<480x1xi32, #tpu.memory_space<vmem>>, %arg3: memref<66x16xf32, #tpu.memory_space<vmem>>, %arg4: memref<1x16xf32, #tpu.memory_space<vmem>>, %arg5: memref<480x16xf32, #tpu.memory_space<vmem>>) attributes {dimension_semantics = [#tpu.dimension_semantics<parallel>], iteration_bounds = array<i64: 2>, scalar_prefetch = 0 : i64, scratch_operands = 0 : i64, tpu.core_type = #tpu.core_type<tc>, window_params = [{transform_indices = @transform_0, window_bounds = array<i64: 480, 1>}, {transform_indices = @transform_1, window_bounds = array<i64: 480, 1>}, {pipeline_mode = #tpu.pipeline_mode<synchronous>, transform_indices = @transform_2, window_bounds = array<i64: 66, 16>}, {pipeline_mode = #tpu.pipeline_mode<synchronous>, transform_indices = @transform_3, window_bounds = array<i64: 1, 16>}, {transform_indices = @transform_4, window_bounds = array<i64: 480, 16>}]} {
    %c0 = arith.constant 0 : index
    %c0_0 = arith.constant 0 : index
    %0 = vector.load %arg1[%c0, %c0_0] : memref<480x1xi32, #tpu.memory_space<vmem>>, vector<480x1xi32>
    %c0_1 = arith.constant 0 : index
    %c0_2 = arith.constant 0 : index
    %1 = vector.load %arg2[%c0_1, %c0_2] : memref<480x1xi32, #tpu.memory_space<vmem>>, vector<480x1xi32>
    %c32_i32 = arith.constant 32 : i32
    %2 = vector.broadcast %c32_i32 : i32 to vector<480x1xi32>
    %3 = arith.addi %0, %2 : vector<480x1xi32>
    %c0_i32 = arith.constant 0 : i32
    %c64_i32 = arith.constant 64 : i32
    %4 = vector.broadcast %c0_i32 : i32 to vector<480x1xi32>
    %5 = arith.maxsi %4, %3 : vector<480x1xi32>
    %6 = vector.broadcast %c64_i32 : i32 to vector<480x1xi32>
    %7 = arith.minsi %6, %5 : vector<480x1xi32>
    %8 = arith.muli %7, %1 : vector<480x1xi32>
    %c1_i32 = arith.constant 1 : i32
    %9 = vector.broadcast %c1_i32 : i32 to vector<480x1xi32>
    %10 = arith.subi %9, %1 : vector<480x1xi32>
    %c65_i32 = arith.constant 65 : i32
    %11 = vector.broadcast %c65_i32 : i32 to vector<480x1xi32>
    %12 = arith.muli %10, %11 : vector<480x1xi32>
    %13 = arith.addi %8, %12 : vector<480x1xi32>
    %14 = tpu.iota {dimensions = array<i32: 1>} : vector<480x66xi32>
    %15 = vector.broadcast %13 : vector<480x1xi32> to vector<480x66xi32>
    %16 = arith.cmpi eq, %14, %15 : vector<480x66xi32>
    %17 = arith.extui %16 : vector<480x66xi1> to vector<480x66xi32>
    %18 = arith.sitofp %17 : vector<480x66xi32> to vector<480x66xf32>
    %c0_3 = arith.constant 0 : index
    %c0_4 = arith.constant 0 : index
    %19 = vector.load %arg3[%c0_3, %c0_4] : memref<66x16xf32, #tpu.memory_space<vmem>>, vector<66x16xf32>
    %cst = arith.constant dense<0.000000e+00> : vector<480x16xf32>
    %20 = tpu.matmul %18, %19, %cst {dimension_numbers = #tpu.dot_dimension_numbers<[1], [0], [0], [1], [0, 0, 1, 1], [], []>} : vector<480x66xf32>, vector<66x16xf32>, vector<480x16xf32> -> vector<480x16xf32>
    %c0_5 = arith.constant 0 : index
    %c0_6 = arith.constant 0 : index
    %21 = vector.load %arg4[%c0_5, %c0_6] : memref<1x16xf32, #tpu.memory_space<vmem>>, vector<1x16xf32>
    %22 = vector.broadcast %21 : vector<1x16xf32> to vector<480x16xf32>
    %23 = arith.addf %20, %22 : vector<480x16xf32>
    %c0_7 = arith.constant 0 : index
    %c0_8 = arith.constant 0 : index
    %24 = vector.load %arg5[%c0_7, %c0_8] : memref<480x16xf32, #tpu.memory_space<vmem>>, vector<480x16xf32>
    tpu.vector_store %arg5[%c0_7, %c0_8], %23 {strides = array<i32>} : memref<480x16xf32, #tpu.memory_space<vmem>>, vector<480x16xf32>,
    return
  }
  func.func @transform_0(%arg0: i32) -> (i32, i32) {
    %c0_i32 = arith.constant 0 : i32
    %c0_i32_0 = arith.constant 0 : i32
    return %arg0, %c0_i32 : i32, i32
  }
  func.func @transform_1(%arg0: i32) -> (i32, i32) {
    %c0_i32 = arith.constant 0 : i32
    %c0_i32_0 = arith.constant 0 : i32
    return %arg0, %c0_i32 : i32, i32
  }
  func.func @transform_2(%arg0: i32) -> (i32, i32) {
    %c0_i32 = arith.constant 0 : i32
    %c0_i32_0 = arith.constant 0 : i32
    %c0_i32_1 = arith.constant 0 : i32
    return %c0_i32, %c0_i32_0 : i32, i32
  }
  func.func @transform_3(%arg0: i32) -> (i32, i32) {
    %c0_i32 = arith.constant 0 : i32
    %c0_i32_0 = arith.constant 0 : i32
    %c0_i32_1 = arith.constant 0 : i32
    return %c0_i32, %c0_i32_0 : i32, i32
  }
  func.func @transform_4(%arg0: i32) -> (i32, i32) {
    %c0_i32 = arith.constant 0 : i32
    %c0_i32_0 = arith.constant 0 : i32
    return %arg0, %c0_i32 : i32, i32
  }
}

</mosaic_0001>

<bundles_post_ra>
// kernel: tpu_custom_call.1
= control target key start
LH: loop header
LB: loop body
LE: loop exit
PB: predicated region body
PF: predicated region fallthrough
CT: control target
= control target key end

     0   :  { %s1976_s15 = smov 0   ;;  %s2698_s0 = inlined_call_operand.vmem [shape: s32[960,1], index: 0, kind: input, shape index: {}]   ;;  %s2699_s1 = inlined_call_operand.vmem [shape: s32[960,1], index: 1, kind: input, shape index: {}]   ;;  %s2700_s2 = inlined_call_operand.vmem [shape: f32[66,16], index: 2, kind: input, shape index: {}]   ;;  %s2701_s3 = inlined_call_operand.vmem [shape: f32[1,16], index: 3, kind: input, shape index: {}]   ;;  %s2702_s4 = inlined_call_operand.vmem [shape: f32[960,16], index: 4, kind: output, shape index: {}]  }
   0x1 LB: > { %s1769_s16 = sadd.s32 4294967295, %s1947_s15   ;;  %p1773_p0 = scmp.ge.s32.totalorder %s1947_s15, 1  ;;  %s1947_s15 = sphi %s1976_s15, %s14_s15  }
   0x2   : > { %p174_p1 = scmp.lt.s32.totalorder %s1947_s15, 3 }
   0x4   : > { %p175_p2 = pnand %p1773_p0, %p174_p1 }
   0x5   : > { %s205_s17 = smul.u32 (!%p175_p2), 60, %s1769_s16 }
   0x6   : > { %178 = sbr.rel (%p175_p2) target bundleno = 432 (0x1b0), region = 36 }
   0x7   : > { %p206_p3 = scmp.lt.s32.totalorder (!%p175_p2), %s205_s17, 119 }
   0xb   : > { %v1949_v0 = vmov 0   ;;  %s2704_s17 = smov (!%p206_p3, %s205_s17), 119 }
   0xc   : > { %1939 = vset.pattern.permute.xlu2 %v1949_v0  ;;  %1938 = vset.pattern.permute.xlu1 %v1949_v0  ;;  %s1984_s18 = sshll.u32 %s2704_s17, 3 }
   0xd   : > { %1937 = vset.pattern.permute.xlu0 %v1949_v0  ;;  %s1990_s21 = scalar_lea.vmem %s2698_s0, %s1984_s18  ;;  %s1996_s24 = scalar_lea.vmem %s2699_s1, %s1984_s18 }
   0xe   : > { %v227_v1 = vld [vmem:[%s1990_s21 + $0x20] sm:$0xff]  ;;  %v225_v3 = vld [vmem:[%s1990_s21 + $0x10] sm:$0xff]  ;;  %v228_v13 = vld [vmem:[%s1990_s21 + $0x28] sm:$0xff]  ;;  %s2484_s23 = scalar_lea.vmem %s2702_s4, %s1984_s18 }
   0xf   : > { %v287_v2 = vld [vmem:[%s1996_s24 + $0x20] sm:$0xff]  ;;  %v347_v4 = vadd.s32 32, %v227_v1  ;;  %v285_v6 = vld [vmem:[%s1996_s24 + $0x10] sm:$0xff]  ;;  %v345_v7 = vadd.s32 32, %v225_v3  ;;  %v348_v15 = vadd.s32 32, %v228_v13  ;;  %v288_v21 = vld [vmem:[%s1996_s24 + $0x28] sm:$0xff] }
  0x10   : > { %v707_v5 = vsub.s32 1, %v287_v2  ;;  %v223_v8 = vld [vmem:[%s1990_s21] sm:$0xff]  ;;  %v705_v10 = vsub.s32 1, %v285_v6  ;;  %v226_v22 = vld [vmem:[%s1990_s21 + $0x18] sm:$0xff]  ;;  %v708_v31 = vsub.s32 1, %v288_v21  ;;  %v224_v33 = vld [vmem:[%s1990_s21 + $0x8] sm:$0xff] }
  0x11   : > { %v283_v9 = vld [vmem:[%s1996_s24] sm:$0xff]  ;;  %v343_v11 = vadd.s32 32, %v223_v8  ;;  %vm411_vm0 = vcmp.gt.s32.totalorder %v347_v4, 0  ;;  %vm407_vm1 = vcmp.gt.s32.totalorder %v345_v7, 0  ;;  %vm413_vm6 = vcmp.gt.s32.totalorder %v348_v15, 0  ;;  %v286_v25 = vld [vmem:[%s1996_s24 + $0x18] sm:$0xff] }
  0x12   : > { %v703_v12 = vsub.s32 1, %v283_v9  ;;  %v767_v14 = vmul.u32 65, %v707_v5  ;;  %v412_v16 = vsel %vm411_vm0, %v347_v4, 0  ;;  %v408_v17 = vsel %vm407_vm1, %v345_v7, 0  ;;  %v284_v34 = vld [vmem:[%s1996_s24 + $0x8] sm:$0xff]  ;;  %v231_v39 = vld [vmem:[%s1990_s21 + $0x40] sm:$0xff] }
  0x13   : > { %v765_v18 = vmul.u32 65, %v705_v10  ;;  %vm403_vm2 = vcmp.gt.s32.totalorder %v343_v11, 0  ;;  %vm531_vm3 = vcmp.lt.s32.totalorder %v412_v16, 64  ;;  %vm527_vm4 = vcmp.lt.s32.totalorder %v408_v17, 64  ;;  %v291_v40 = vld [vmem:[%s1996_s24 + $0x40] sm:$0xff]  ;;  %v230_v44 = vld [vmem:[%s1990_s21 + $0x38] sm:$0xff] }
  0x14   : > { %v404_v19 = vsel %vm403_vm2, %v343_v11, 0  ;;  %v763_v20 = vmul.u32 65, %v703_v12  ;;  %v532_v23 = vsel %vm531_vm3, %v412_v16, 64  ;;  %v528_v24 = vsel %vm527_vm4, %v408_v17, 64  ;;  %v290_v52 = vld [vmem:[%s1996_s24 + $0x38] sm:$0xff]  ;;  %v229_v61 = vld [vmem:[%s1990_s21 + $0x30] sm:$0xff] }
  0x15   : > { %vm523_vm5 = vcmp.lt.s32.totalorder %v404_v19, 64  ;;  %v647_v26 = vmul.u32 %v532_v23, %v287_v2  ;;  %v645_v27 = vmul.u32 %v528_v24, %v285_v6  ;;  %v414_v29 = vsel %vm413_vm6, %v348_v15, 0  ;;  %v289_v62 = vld [vmem:[%s1996_s24 + $0x30] sm:$0xff]  ;;  %v234_v2 = vld [vmem:[%s1990_s21 + $0x58] sm:$0xff] }
  0x16   : > { %v524_v28 = vsel %vm523_vm5, %v404_v19, 64  ;;  %vm533_vm7 = vcmp.lt.s32.totalorder %v414_v29, 64  ;;  %v346_v32 = vadd.s32 32, %v226_v22  ;;  %v706_v38 = vsub.s32 1, %v286_v25  ;;  %v294_v6 = vld [vmem:[%s1996_s24 + $0x58] sm:$0xff]  ;;  %v233_v7 = vld [vmem:[%s1990_s21 + $0x50] sm:$0xff] }
  0x17   : > { %v643_v30 = vmul.u32 %v524_v28, %v283_v9  ;;  %v827_v35 = vadd.s32 %v767_v14, %v647_v26  ;;  %v825_v36 = vadd.s32 %v765_v18, %v645_v27  ;;  %v534_v37 = vsel %vm533_vm7, %v414_v29, 64  ;;  %v293_v15 = vld [vmem:[%s1996_s24 + $0x50] sm:$0xff]  ;;  %v232_v19 = vld [vmem:[%s1990_s21 + $0x48] sm:$0xff] }
  0x18   : > { %v648_v42 = vmul.u32 %v534_v37, %v288_v21  ;;  %v768_v43 = vmul.u32 65, %v708_v31  ;;  %vm409_vm8 = vcmp.gt.s32.totalorder %v346_v32, 0  ;;  %v766_v46 = vmul.u32 65, %v706_v38  ;;  %v268_v29 = vld [vmem:[%s1990_s21 + $0x168] sm:$0xff] }
  0x19   : > { %v823_v41 = vadd.s32 %v763_v20, %v643_v30  ;;  %898 = vperm.xlu2 %1939, %v827_v35   ;;  %892 = vperm.xlu1 %1938, %v825_v36   ;;  %v410_v45 = vsel %vm409_vm8, %v346_v32, 0  ;;  %v344_v47 = vadd.s32 32, %v224_v33  ;;  %v704_v48 = vsub.s32 1, %v284_v34  ;;  %v253_v36 = vld [vmem:[%s1990_s21 + $0xf0] sm:$0xff] }
  0x1a   : > { %v828_v49 = vadd.s32 %v768_v43, %v648_v42  ;;  %vm529_vm9 = vcmp.lt.s32.totalorder %v410_v45, 64  ;;  %v351_v50 = vadd.s32 32, %v231_v39  ;;  %v711_v51 = vsub.s32 1, %v291_v40  ;;  %v328_v42 = vld [vmem:[%s1996_s24 + $0x168] sm:$0xff]  ;;  %v235_v43 = vld [vmem:[%s1990_s21 + $0x60] sm:$0xff] }
  0x1b   : > { %886 = vperm.xlu0 %1937, %v823_v41   ;;  %v530_v53 = vsel %vm529_vm9, %v410_v45, 64  ;;  %vm405_vm10 = vcmp.gt.s32.totalorder %v344_v47, 0  ;;  %v764_v54 = vmul.u32 65, %v704_v48  ;;  %v350_v55 = vadd.s32 32, %v230_v44  ;;  %v313_v45 = vld [vmem:[%s1996_s24 + $0xf0] sm:$0xff] }
  0x1c   : > { %v646_v56 = vmul.u32 %v530_v53, %v286_v25  ;;  %v406_v57 = vsel %vm405_vm10, %v344_v47, 0  ;;  %vm419_vm11 = vcmp.gt.s32.totalorder %v351_v50, 0  ;;  %v771_v58 = vmul.u32 65, %v711_v51  ;;  %v292_v25 = vld [vmem:[%s1996_s24 + $0x48] sm:$0xff]  ;;  %v295_v51 = vld [vmem:[%s1996_s24 + $0x60] sm:$0xff] }
  0x1d   : > { %vm525_vm12 = vcmp.lt.s32.totalorder %v406_v57, 64  ;;  %v420_v59 = vsel %vm419_vm11, %v351_v50, 0  ;;  %vm417_vm13 = vcmp.gt.s32.totalorder %v350_v55, 0  ;;  %v710_v60 = vsub.s32 1, %v290_v52 }
  0x1e   : > { %v826_v63 = vadd.s32 %v766_v46, %v646_v56  ;;  %v526_v0 = vsel %vm525_vm12, %v406_v57, 64  ;;  %vm539_vm14 = vcmp.lt.s32.totalorder %v420_v59, 64  ;;  %v418_v1 = vsel %vm417_vm13, %v350_v55, 0 }
  0x1f   : > { %v644_v3 = vmul.u32 %v526_v0, %v284_v34  ;;  %v540_v4 = vsel %vm539_vm14, %v420_v59, 64  ;;  %vm537_vm15 = vcmp.lt.s32.totalorder %v418_v1, 64  ;;  %v770_v5 = vmul.u32 65, %v710_v60  ;;  %v254_v59 = vld [vmem:[%s1990_s21 + $0xf8] sm:$0xff] }
  0x20   : > { %v651_v8 = vmul.u32 %v540_v4, %v291_v40  ;;  %v538_v9 = vsel %vm537_vm15, %v418_v1, 64  ;;  %v349_v10 = vadd.s32 32, %v229_v61  ;;  %v709_v11 = vsub.s32 1, %v289_v62  ;;  %v238_v4 = vld [vmem:[%s1990_s21 + $0x78] sm:$0xff] }
  0x21   : > { %901 = vperm.xlu2 %1939, %v828_v49   ;;  %895 = vperm.xlu1 %1938, %v826_v63   ;;  %v824_v12 = vadd.s32 %v764_v54, %v644_v3  ;;  %v650_v13 = vmul.u32 %v538_v9, %v290_v52  ;;  %v354_v14 = vadd.s32 32, %v234_v2  ;;  %v714_v17 = vsub.s32 1, %v294_v6  ;;  %v269_v54 = vld [vmem:[%s1990_s21 + $0x170] sm:$0xff]  ;;  %v314_v9 = vld [vmem:[%s1996_s24 + $0xf8] sm:$0xff] }
  0x22   : > { %v831_v16 = vadd.s32 %v771_v58, %v651_v8  ;;  %vm415_vm0 = vcmp.gt.s32.totalorder %v349_v10, 0  ;;  %v353_v18 = vadd.s32 32, %v233_v7  ;;  %v769_v22 = vmul.u32 65, %v709_v11  ;;  %v329_v8 = vld [vmem:[%s1996_s24 + $0x170] sm:$0xff] }
  0x23   : > { %889 = vperm.xlu0 %1937, %v824_v12   ;;  %v830_v20 = vadd.s32 %v770_v5, %v650_v13  ;;  %v416_v21 = vsel %vm415_vm0, %v349_v10, 0  ;;  %vm425_vm1 = vcmp.gt.s32.totalorder %v354_v14, 0  ;;  %v713_v24 = vsub.s32 1, %v293_v15  ;;  %v270_v13 = vld [vmem:[%s1990_s21 + $0x178] sm:$0xff] }
  0x24   : > { %vm535_vm2 = vcmp.lt.s32.totalorder %v416_v21, 64  ;;  %v426_v23 = vsel %vm425_vm1, %v354_v14, 0  ;;  %vm423_vm3 = vcmp.gt.s32.totalorder %v353_v18, 0  ;;  %v352_v28 = vadd.s32 32, %v232_v19  ;;  %v298_v19 = vld [vmem:[%s1996_s24 + $0x78] sm:$0xff] }
  0x25   : > { %v536_v26 = vsel %vm535_vm2, %v416_v21, 64  ;;  %vm545_vm4 = vcmp.lt.s32.totalorder %v426_v23, 64  ;;  %v424_v27 = vsel %vm423_vm3, %v353_v18, 0  ;;  %v774_v32 = vmul.u32 65, %v714_v17 }
  0x26   : > { %v649_v30 = vmul.u32 %v536_v26, %v289_v62  ;;  %v546_v31 = vsel %vm545_vm4, %v426_v23, 64  ;;  %vm543_vm5 = vcmp.lt.s32.totalorder %v424_v27, 64  ;;  %vm421_vm6 = vcmp.gt.s32.totalorder %v352_v28, 0 }
  0x27   : > { %v654_v33 = vmul.u32 %v546_v31, %v294_v6  ;;  %v544_v34 = vsel %vm543_vm5, %v424_v27, 64  ;;  %v712_v35 = vsub.s32 1, %v292_v25  ;;  %v422_v38 = vsel %vm421_vm6, %v352_v28, 0 }
  0x28   : > { %v829_v37 = vadd.s32 %v769_v22, %v649_v30  ;;  %v388_v39 = vadd.s32 32, %v268_v29  ;;  %v653_v40 = vmul.u32 %v544_v34, %v293_v15  ;;  %v773_v41 = vmul.u32 65, %v713_v24  ;;  %v239_v29 = vld [vmem:[%s1990_s21 + $0x80] sm:$0xff] }
  0x29   : > { %910 = vperm.xlu2 %1939, %v831_v16   ;;  %907 = vperm.xlu1 %1938, %v830_v20   ;;  %vm541_vm7 = vcmp.lt.s32.totalorder %v422_v38, 64  ;;  %v373_v46 = vadd.s32 32, %v253_v36  ;;  %v834_v47 = vadd.s32 %v774_v32, %v654_v33  ;;  %v772_v49 = vmul.u32 65, %v712_v35  ;;  %v255_v20 = vld [vmem:[%s1990_s21 + $0x100] sm:$0xff]  ;;  %v330_v36 = vld [vmem:[%s1996_s24 + $0x178] sm:$0xff] }
  0x2a   : > { %v542_v44 = vsel %vm541_vm7, %v422_v38, 64  ;;  %vm493_vm8 = vcmp.gt.s32.totalorder %v388_v39, 0  ;;  %v748_v52 = vsub.s32 1, %v328_v42  ;;  %v355_v53 = vadd.s32 32, %v235_v43  ;;  %v315_v38 = vld [vmem:[%s1996_s24 + $0x100] sm:$0xff]  ;;  %v256_v43 = vld [vmem:[%s1990_s21 + $0x108] sm:$0xff] }
  0x2b   : > { %904 = vperm.xlu0 %1937, %v829_v37   ;;  %v652_v48 = vmul.u32 %v542_v44, %v292_v25  ;;  %v494_v50 = vsel %vm493_vm8, %v388_v39, 0  ;;  %vm463_vm10 = vcmp.gt.s32.totalorder %v373_v46, 0  ;;  %v833_v55 = vadd.s32 %v773_v41, %v653_v40  ;;  %v271_v37 = vld [vmem:[%s1990_s21 + $0x180] sm:$0xff] }
  0x2c   : > { %vm613_vm9 = vcmp.lt.s32.totalorder %v494_v50, 64  ;;  %v464_v57 = vsel %vm463_vm10, %v373_v46, 0  ;;  %v733_v58 = vsub.s32 1, %v313_v45  ;;  %vm427_vm12 = vcmp.gt.s32.totalorder %v355_v53, 0  ;;  %v299_v46 = vld [vmem:[%s1996_s24 + $0x80] sm:$0xff] }
  0x2d   : > { %v614_v56 = vsel %vm613_vm9, %v494_v50, 64  ;;  %vm583_vm11 = vcmp.lt.s32.totalorder %v464_v57, 64  ;;  %v715_v60 = vsub.s32 1, %v295_v51  ;;  %v832_v61 = vadd.s32 %v772_v49, %v652_v48 }
  0x2e   : > { %v584_v62 = vsel %vm583_vm11, %v464_v57, 64  ;;  %v428_v63 = vsel %vm427_vm12, %v355_v53, 0  ;;  %v389_v0 = vadd.s32 32, %v269_v54  ;;  %v688_v1 = vmul.u32 %v614_v56, %v328_v42  ;;  %v240_v54 = vld [vmem:[%s1990_s21 + $0x88] sm:$0xff]  ;;  %v2044_v57 = vld [vmem:[%s1996_s24 + $0x180] sm:$0xff] }
  0x2f   : > { %v808_v2 = vmul.u32 65, %v748_v52  ;;  %vm547_vm13 = vcmp.lt.s32.totalorder %v428_v63, 64  ;;  %v374_v3 = vadd.s32 32, %v254_v59  ;;  %v673_v5 = vmul.u32 %v584_v62, %v313_v45  ;;  %v2047_v59 = vld [vmem:[%s1996_s24 + $0x108] sm:$0xff] }
  0x30   : > { %v793_v6 = vmul.u32 65, %v733_v58  ;;  %v548_v7 = vsel %vm547_vm13, %v428_v63, 64  ;;  %vm495_vm14 = vcmp.gt.s32.totalorder %v389_v0, 0  ;;  %v775_v11 = vmul.u32 65, %v715_v60  ;;  %v272_v60 = vld [vmem:[%s1990_s21 + $0x188] sm:$0xff] }
  0x31   : > { %919 = vperm.xlu2 %1939, %v834_v47   ;;  %916 = vperm.xlu1 %1938, %v833_v55   ;;  %v655_v10 = vmul.u32 %v548_v7, %v295_v51  ;;  %v496_v12 = vsel %vm495_vm14, %v389_v0, 0  ;;  %vm465_vm15 = vcmp.gt.s32.totalorder %v374_v3, 0  ;;  %v358_v15 = vadd.s32 32, %v238_v4  ;;  %v257_v7 = vld [vmem:[%s1990_s21 + $0x110] sm:$0xff] }
  0x32   : > { %vm615_vm0 = vcmp.lt.s32.totalorder %v496_v12, 64  ;;  %v466_v14 = vsel %vm465_vm15, %v374_v3, 0  ;;  %v868_v16 = vadd.s32 %v808_v2, %v688_v1  ;;  %v749_v17 = vsub.s32 1, %v329_v8 }
  0x33   : > { %913 = vperm.xlu0 %1937, %v832_v61   ;;  %vm585_vm1 = vcmp.lt.s32.totalorder %v466_v14, 64  ;;  %v734_v18 = vsub.s32 1, %v314_v9  ;;  %v853_v21 = vadd.s32 %v793_v6, %v673_v5  ;;  %v616_v22 = vsel %vm615_vm0, %v496_v12, 64 }
  0x34   : > { %vm433_vm2 = vcmp.gt.s32.totalorder %v358_v15, 0  ;;  %v390_v23 = vadd.s32 32, %v270_v13  ;;  %v835_v24 = vadd.s32 %v775_v11, %v655_v10  ;;  %v586_v25 = vsel %vm585_vm1, %v466_v14, 64  ;;  %v300_v11 = vld [vmem:[%s1996_s24 + $0x88] sm:$0xff]  ;;  %v241_v13 = vld [vmem:[%s1990_s21 + $0x90] sm:$0xff] }
  0x35   : > { %v434_v26 = vsel %vm433_vm2, %v358_v15, 0  ;;  %v718_v27 = vsub.s32 1, %v298_v19  ;;  %v375_v28 = vadd.s32 32, %v255_v20  ;;  %v689_v30 = vmul.u32 %v616_v22, %v329_v8  ;;  %v273_v22 = vld [vmem:[%s1990_s21 + $0x190] sm:$0xff] }
  0x36   : > { %vm553_vm3 = vcmp.lt.s32.totalorder %v434_v26, 64  ;;  %vm497_vm4 = vcmp.gt.s32.totalorder %v390_v23, 0  ;;  %v809_v31 = vmul.u32 65, %v749_v17  ;;  %v674_v34 = vmul.u32 %v586_v25, %v314_v9 }
  0x37   : > { %v554_v32 = vsel %vm553_vm3, %v434_v26, 64  ;;  %v498_v33 = vsel %vm497_vm4, %v390_v23, 0  ;;  %v794_v35 = vmul.u32 65, %v734_v18  ;;  %vm467_vm5 = vcmp.gt.s32.totalorder %v375_v28, 0 }
  0x38   : > { %vm617_vm6 = vcmp.lt.s32.totalorder %v498_v33, 64  ;;  %v468_v39 = vsel %vm467_vm5, %v375_v28, 0  ;;  %v359_v40 = vadd.s32 32, %v239_v29  ;;  %v658_v41 = vmul.u32 %v554_v32, %v298_v19  ;;  %v258_v32 = vld [vmem:[%s1990_s21 + $0x118] sm:$0xff] }
  0x39   : > { %1021 = vperm.xlu2 %1939, %v868_v16   ;;  %976 = vperm.xlu1 %1938, %v853_v21   ;;  %v778_v42 = vmul.u32 65, %v718_v27  ;;  %vm587_vm7 = vcmp.lt.s32.totalorder %v468_v39, 64  ;;  %v869_v44 = vadd.s32 %v809_v31, %v689_v30  ;;  %v750_v45 = vsub.s32 1, %v330_v36  ;;  %v2057_v16 = vld [vmem:[%s1996_s24 + $0x188] sm:$0xff] }
  0x3a   : > { %vm435_vm8 = vcmp.gt.s32.totalorder %v359_v40, 0  ;;  %v391_v47 = vadd.s32 32, %v271_v37  ;;  %v854_v48 = vadd.s32 %v794_v35, %v674_v34  ;;  %v618_v49 = vsel %vm617_vm6, %v498_v33, 64  ;;  %v317_v33 = vld [vmem:[%s1996_s24 + $0x110] sm:$0xff] }
  0x3b   : > { %922 = vperm.xlu0 %1937, %v835_v24   ;;  %v735_v50 = vsub.s32 1, %v315_v38  ;;  %v436_v51 = vsel %vm435_vm8, %v359_v40, 0  ;;  %v588_v52 = vsel %vm587_vm7, %v468_v39, 64  ;;  %v376_v53 = vadd.s32 32, %v256_v43  ;;  %v301_v37 = vld [vmem:[%s1996_s24 + $0x90] sm:$0xff] }
  0x3c   : > { %vm555_vm9 = vcmp.lt.s32.totalorder %v436_v51, 64  ;;  %vm499_vm10 = vcmp.gt.s32.totalorder %v391_v47, 0  ;;  %v838_v55 = vadd.s32 %v778_v42, %v658_v41  ;;  %v719_v56 = vsub.s32 1, %v299_v46 }
  0x3d   : > { %v500_v58 = vsel %vm499_vm10, %v391_v47, 0  ;;  %v690_v61 = vmul.u32 %v618_v49, %v330_v36  ;;  %v810_v62 = vmul.u32 65, %v750_v45  ;;  %v556_v63 = vsel %vm555_vm9, %v436_v51, 64  ;;  %v274_v45 = vld [vmem:[%s1990_s21 + $0x198] sm:$0xff] }
  0x3e   : > { %vm469_vm11 = vcmp.gt.s32.totalorder %v376_v53, 0  ;;  %v675_v0 = vmul.u32 %v588_v52, %v315_v38  ;;  %v795_v1 = vmul.u32 65, %v735_v50  ;;  %v360_v3 = vadd.s32 32, %v240_v54  ;;  %v242_v38 = vld [vmem:[%s1990_s21 + $0x98] sm:$0xff] }
  0x3f   : > { %v470_v2 = vsel %vm469_vm11, %v376_v53, 0  ;;  %vm619_vm12 = vcmp.lt.s32.totalorder %v500_v58, 64  ;;  %v751_v4 = vsub.s32 1, %v2044_v57  ;;  %v736_v5 = vsub.s32 1, %v2047_v59 }
  0x40   : > { %v392_v6 = vadd.s32 32, %v272_v60  ;;  %v659_v8 = vmul.u32 %v556_v63, %v299_v46  ;;  %v779_v9 = vmul.u32 65, %v719_v56  ;;  %vm589_vm13 = vcmp.lt.s32.totalorder %v470_v2, 64  ;;  %v243_v60 = vld [vmem:[%s1990_s21 + $0xa0] sm:$0xff] }
  0x41   : > { %1024 = vperm.xlu2 %1939, %v869_v44   ;;  %979 = vperm.xlu1 %1938, %v854_v48   ;;  %vm437_vm14 = vcmp.gt.s32.totalorder %v360_v3, 0  ;;  %v870_v10 = vadd.s32 %v810_v62, %v690_v61  ;;  %v855_v14 = vadd.s32 %v795_v1, %v675_v0  ;;  %v620_v15 = vsel %vm619_vm12, %v500_v58, 64  ;;  %v333_v58 = vld [vmem:[%s1996_s24 + $0x190] sm:$0xff]  ;;  %v302_v1 = vld [vmem:[%s1996_s24 + $0x98] sm:$0xff] }
  0x42   : > { %v438_v12 = vsel %vm437_vm14, %v360_v3, 0  ;;  %vm501_vm15 = vcmp.gt.s32.totalorder %v392_v6, 0  ;;  %v377_v17 = vadd.s32 32, %v257_v7  ;;  %v811_v18 = vmul.u32 65, %v751_v4 }
  0x43   : > { %931 = vperm.xlu0 %1937, %v838_v55   ;;  %vm557_vm0 = vcmp.lt.s32.totalorder %v438_v12, 64  ;;  %v590_v19 = vsel %vm589_vm13, %v470_v2, 64  ;;  %v796_v20 = vmul.u32 65, %v736_v5  ;;  %v502_v21 = vsel %vm501_vm15, %v392_v6, 0  ;;  %v259_v55 = vld [vmem:[%s1990_s21 + $0x120] sm:$0xff] }
  0x44   : > { %v839_v23 = vadd.s32 %v779_v9, %v659_v8  ;;  %v720_v24 = vsub.s32 1, %v300_v11  ;;  %vm471_vm1 = vcmp.gt.s32.totalorder %v377_v17, 0  ;;  %v361_v25 = vadd.s32 32, %v241_v13  ;;  %v275_v6 = vld [vmem:[%s1990_s21 + $0x1a0] sm:$0xff]  ;;  %v260_v13 = vld [vmem:[%s1990_s21 + $0x128] sm:$0xff] }
  0x45   : > { %v691_v26 = vmul.u32 %v620_v15, %v2044_v57  ;;  %v558_v27 = vsel %vm557_vm0, %v438_v12, 64  ;;  %v752_v28 = vsub.s32 1, %v2057_v16  ;;  %v472_v29 = vsel %vm471_vm1, %v377_v17, 0  ;;  %v2076_v12 = vld [vmem:[%s1996_s24 + $0x198] sm:$0xff] }
  0x46   : > { %v676_v30 = vmul.u32 %v590_v19, %v2047_v59  ;;  %vm621_vm2 = vcmp.lt.s32.totalorder %v502_v21, 64  ;;  %vm439_vm3 = vcmp.gt.s32.totalorder %v361_v25, 0  ;;  %v393_v31 = vadd.s32 32, %v273_v22  ;;  %v318_v59 = vld [vmem:[%s1996_s24 + $0x118] sm:$0xff] }
  0x47   : > { %v440_v34 = vsel %vm439_vm3, %v361_v25, 0  ;;  %v660_v35 = vmul.u32 %v558_v27, %v300_v11  ;;  %v780_v36 = vmul.u32 65, %v720_v24  ;;  %vm591_vm4 = vcmp.lt.s32.totalorder %v472_v29, 64 }
  0x48   : > { %v622_v39 = vsel %vm621_vm2, %v502_v21, 64  ;;  %vm559_vm5 = vcmp.lt.s32.totalorder %v440_v34, 64  ;;  %vm503_vm6 = vcmp.gt.s32.totalorder %v393_v31, 0  ;;  %v378_v40 = vadd.s32 32, %v258_v32  ;;  %v244_v21 = vld [vmem:[%s1990_s21 + $0xa8] sm:$0xff] }
  0x49   : > { %1027 = vperm.xlu2 %1939, %v870_v10   ;;  %982 = vperm.xlu1 %1938, %v855_v14   ;;  %v871_v41 = vadd.s32 %v811_v18, %v691_v26  ;;  %v856_v42 = vadd.s32 %v796_v20, %v676_v30  ;;  %v812_v43 = vmul.u32 65, %v752_v28  ;;  %v737_v44 = vsub.s32 1, %v317_v33  ;;  %v319_v20 = vld [vmem:[%s1996_s24 + $0x120] sm:$0xff] }
  0x4a   : > { %v592_v46 = vsel %vm591_vm4, %v472_v29, 64  ;;  %v721_v47 = vsub.s32 1, %v301_v37  ;;  %vm473_vm7 = vcmp.gt.s32.totalorder %v378_v40, 0  ;;  %v362_v48 = vadd.s32 32, %v242_v38  ;;  %v303_v30 = vld [vmem:[%s1996_s24 + $0xa0] sm:$0xff] }
  0x4b   : > { %934 = vperm.xlu0 %1937, %v839_v23   ;;  %v840_v49 = vadd.s32 %v780_v36, %v660_v35  ;;  %v692_v50 = vmul.u32 %v622_v39, %v2057_v16  ;;  %v560_v51 = vsel %vm559_vm5, %v440_v34, 64  ;;  %v504_v52 = vsel %vm503_vm6, %v393_v31, 0  ;;  %v276_v36 = vld [vmem:[%s1990_s21 + $0x1a8] sm:$0xff] }
  0x4c   : > { %v474_v53 = vsel %vm473_vm7, %v378_v40, 0  ;;  %vm441_vm8 = vcmp.gt.s32.totalorder %v362_v48, 0  ;;  %v394_v54 = vadd.s32 32, %v274_v45  ;;  %v677_v56 = vmul.u32 %v592_v46, %v317_v33  ;;  %v261_v40 = vld [vmem:[%s1990_s21 + $0x130] sm:$0xff] }
  0x4d   : > { %v797_v57 = vmul.u32 65, %v737_v44  ;;  %v661_v61 = vmul.u32 %v560_v51, %v301_v37  ;;  %v781_v62 = vmul.u32 65, %v721_v47  ;;  %vm623_vm9 = vcmp.lt.s32.totalorder %v504_v52, 64 }
  0x4e   : > { %v442_v63 = vsel %vm441_vm8, %v362_v48, 0  ;;  %v872_v0 = vadd.s32 %v812_v43, %v692_v50  ;;  %vm593_vm10 = vcmp.lt.s32.totalorder %v474_v53, 64  ;;  %v379_v2 = vadd.s32 32, %v259_v55  ;;  %v2087_v43 = vld [vmem:[%s1996_s24 + $0x1a0] sm:$0xff]  ;;  %v2091_v48 = vld [vmem:[%s1996_s24 + $0x128] sm:$0xff]  ;;  %v245_v50 = vld [vmem:[%s1990_s21 + $0xb0] sm:$0xff] }
  0x4f   : > { %v753_v3 = vsub.s32 1, %v333_v58  ;;  %v738_v4 = vsub.s32 1, %v318_v59  ;;  %vm505_vm11 = vcmp.gt.s32.totalorder %v394_v54, 0  ;;  %v363_v5 = vadd.s32 32, %v243_v60 }
  0x50   : > { %v857_v7 = vadd.s32 %v797_v57, %v677_v56  ;;  %v624_v8 = vsel %vm623_vm9, %v504_v52, 64  ;;  %vm561_vm12 = vcmp.lt.s32.totalorder %v442_v63, 64  ;;  %vm475_vm13 = vcmp.gt.s32.totalorder %v379_v2, 0 }
  0x51   : > { %1030 = vperm.xlu2 %1939, %v871_v41   ;;  %985 = vperm.xlu1 %1938, %v856_v42   ;;  %v841_v9 = vadd.s32 %v781_v62, %v661_v61  ;;  %v594_v10 = vsel %vm593_vm10, %v474_v53, 64  ;;  %v722_v11 = vsub.s32 1, %v302_v1  ;;  %v506_v14 = vsel %vm505_vm11, %v394_v54, 0  ;;  %v2100_v62 = vld [vmem:[%s1996_s24 + $0xa8] sm:$0xff] }
  0x52   : > { %v476_v15 = vsel %vm475_vm13, %v379_v2, 0  ;;  %vm443_vm14 = vcmp.gt.s32.totalorder %v363_v5, 0  ;;  %v395_v16 = vadd.s32 32, %v275_v6  ;;  %v693_v17 = vmul.u32 %v624_v8, %v333_v58  ;;  %v1253_v58 = vld [vmem:[%s2700_s2 + $0x40] sm:$0x3]  ;;  %v2109_v8 = vld [vmem:[%s1996_s24 + $0x1a8] sm:$0xff] }
  0x53   : > { %937 = vperm.xlu0 %1937, %v840_v49   ;;  %v813_v18 = vmul.u32 65, %v753_v3  ;;  %v562_v19 = vsel %vm561_vm12, %v442_v63, 64  ;;  %v678_v22 = vmul.u32 %v594_v10, %v318_v59  ;;  %v798_v23 = vmul.u32 65, %v738_v4  ;;  %v277_v3 = vld [vmem:[%s1990_s21 + $0x1b0] sm:$0xff]  ;;  %v262_v4 = vld [vmem:[%s1990_s21 + $0x138] sm:$0xff] }
  0x54   : > { %v754_v24 = vsub.s32 1, %v2076_v12  ;;  %v380_v25 = vadd.s32 32, %v260_v13  ;;  %v782_v26 = vmul.u32 65, %v722_v11  ;;  %vm625_vm15 = vcmp.lt.s32.totalorder %v506_v14, 64 }
  0x55   : > { %vm595_vm0 = vcmp.lt.s32.totalorder %v476_v15, 64  ;;  %v444_v27 = vsel %vm443_vm14, %v363_v5, 0  ;;  %v662_v28 = vmul.u32 %v562_v19, %v302_v1  ;;  %v739_v29 = vsub.s32 1, %v319_v20  ;;  %v2126_v19 = vld [vmem:[%s1996_s24 + $0x130] sm:$0xff] }
  0x56   : > { %vm507_vm1 = vcmp.gt.s32.totalorder %v395_v16, 0  ;;  %v364_v31 = vadd.s32 32, %v244_v21  ;;  %v873_v32 = vadd.s32 %v813_v18, %v693_v17  ;;  %vm477_vm2 = vcmp.gt.s32.totalorder %v380_v25, 0  ;;  %v2122_v17 = vld [vmem:[%s2700_s2 + $0x28] sm:$0xff] }
  0x57   : > { %v858_v33 = vadd.s32 %v798_v23, %v678_v22  ;;  %v626_v34 = vsel %vm625_vm15, %v506_v14, 64  ;;  %v596_v35 = vsel %vm595_vm0, %v476_v15, 64  ;;  %vm563_vm3 = vcmp.lt.s32.totalorder %v444_v27, 64  ;;  %v246_v14 = vld [vmem:[%s1990_s21 + $0xb8] sm:$0xff] }
  0x58   : > { %v814_v37 = vmul.u32 65, %v754_v24  ;;  %v723_v38 = vsub.s32 1, %v303_v30  ;;  %v508_v39 = vsel %vm507_vm1, %v395_v16, 0  ;;  %v842_v41 = vadd.s32 %v782_v26, %v662_v28  ;;  %v2133_v24 = vld [vmem:[%s2700_s2 + $0x20] sm:$0xff]  ;;  %v2137_v28 = vld [vmem:[%s1996_s24 + $0xb0] sm:$0xff] }
  0x59   : > { %1033 = vperm.xlu2 %1939, %v872_v0   ;;  %988 = vperm.xlu1 %1938, %v857_v7   ;;  %v799_v42 = vmul.u32 65, %v739_v29  ;;  %v478_v44 = vsel %vm477_vm2, %v380_v25, 0  ;;  %vm445_vm4 = vcmp.gt.s32.totalorder %v364_v31, 0  ;;  %v694_v45 = vmul.u32 %v626_v34, %v2076_v12  ;;  %v1252_v0 = vld [vmem:[%s2700_s2 + $0x38] sm:$0xff]  ;;  %v263_v34 = vld [vmem:[%s1990_s21 + $0x140] sm:$0xff] }
  0x5a   : > { %v679_v46 = vmul.u32 %v596_v35, %v319_v20  ;;  %v564_v47 = vsel %vm563_vm3, %v444_v27, 64  ;;  %v396_v49 = vadd.s32 32, %v276_v36  ;;  %vm627_vm5 = vcmp.lt.s32.totalorder %v508_v39, 64 }
  0x5b   : > { %940 = vperm.xlu0 %1937, %v841_v9   ;;  %v381_v51 = vadd.s32 32, %v261_v40  ;;  %v783_v52 = vmul.u32 65, %v723_v38  ;;  %v755_v53 = vsub.s32 1, %v2087_v43  ;;  %vm597_vm6 = vcmp.lt.s32.totalorder %v478_v44, 64  ;;  %v1251_v9 = vld [vmem:[%s2700_s2 + $0x30] sm:$0xff] }
  0x5c   : > { %v446_v54 = vsel %vm445_vm4, %v364_v31, 0  ;;  %v663_v55 = vmul.u32 %v564_v47, %v303_v30  ;;  %v740_v56 = vsub.s32 1, %v2091_v48  ;;  %vm509_vm7 = vcmp.gt.s32.totalorder %v396_v49, 0  ;;  %v2145_v30 = vld [vmem:[%s2700_s2 + $0x18] sm:$0xff]  ;;  %v2157_v38 = vld [vmem:[%s2700_s2 + $0x10] sm:$0xff] }
  0x5d   : > { %v365_v57 = vadd.s32 32, %v245_v50  ;;  %v874_v59 = vadd.s32 %v814_v37, %v694_v45  ;;  %v859_v60 = vadd.s32 %v799_v42, %v679_v46  ;;  %v628_v61 = vsel %vm627_vm5, %v508_v39, 64  ;;  %v278_v31 = vld [vmem:[%s1990_s21 + $0x1b8] sm:$0xff]  ;;  %v247_v39 = vld [vmem:[%s1990_s21 + $0xc0] sm:$0xff]  ;;  %v2168_v46 = vld [vmem:[%s1996_s24 + $0x1b0] sm:$0xff] }
  0x5e   : > { %v598_v63 = vsel %vm597_vm6, %v478_v44, 64  ;;  %vm565_vm8 = vcmp.lt.s32.totalorder %v446_v54, 64  ;;  %vm479_vm9 = vcmp.gt.s32.totalorder %v381_v51, 0  ;;  %vm1439_vm10 = vcmask 1041408  }
  0x5f   : > { %v815_v1 = vmul.u32 65, %v755_v53  ;;  %v510_v2 = vsel %vm509_vm7, %v396_v49, 0  ;;  %1837 = vmatpush.msk.msra.mxu0 %vm1439_vm10, %v1253_v58  ;;  %1902 = vmatpush.msk.msra.mxu3 %vm1439_vm10, %v1253_v58  ;;  %v843_v5 = vadd.s32 %v783_v52, %v663_v55  ;;  %v800_v6 = vmul.u32 65, %v740_v56  ;;  %v2176_v49 = vld [vmem:[%s1996_s24 + $0x138] sm:$0xff]  ;;  %v2187_v55 = vld [vmem:[%s2700_s2] sm:$0xff] }
  0x60   : > { %v724_v7 = vsub.s32 1, %v2100_v62  ;;  %vm447_vm11 = vcmp.gt.s32.totalorder %v365_v57, 0  ;;  %1901 = vmatpush.msk.msra.mxu2 %vm1439_vm10, %v1253_v58  ;;  %1900 = vmatpush.msk.msra.mxu1 %vm1439_vm10, %v1253_v58  ;;  %v695_v10 = vmul.u32 %v628_v61, %v2087_v43  ;;  %v680_v11 = vmul.u32 %v598_v63, %v2091_v48  ;;  %v2173_v48 = vld [vmem:[%s2700_s2 + $0x8] sm:$0xff]  ;;  %v2192_v58 = vld [vmem:[%s1996_s24 + $0xb8] sm:$0xff] }
  0x61   : > { %1036 = vperm.xlu2 %1939, %v873_v32   ;;  %991 = vperm.xlu1 %1938, %v858_v33   ;;  %v566_v12 = vsel %vm565_vm8, %v446_v54, 64  ;;  %v480_v13 = vsel %vm479_vm9, %v381_v51, 0  ;;  %vm629_vm12 = vcmp.lt.s32.totalorder %v510_v2, 64  ;;  %v397_v15 = vadd.s32 32, %v277_v3 }
  0x62   : > { %1451 = vmatpush.msra.mxu0 %v1252_v0  ;;  %1905 = vmatpush.msra.mxu3 %v1252_v0  ;;  %v382_v16 = vadd.s32 32, %v262_v4  ;;  %v756_v18 = vsub.s32 1, %v2109_v8  ;;  %v448_v20 = vsel %vm447_vm11, %v365_v57, 0  ;;  %v664_v21 = vmul.u32 %v566_v12, %v2100_v62  ;;  %v264_v62 = vld [vmem:[%s1990_s21 + $0x148] sm:$0xff] }
  0x63   : > { %943 = vperm.xlu0 %1937, %v842_v41   ;;  %v784_v22 = vmul.u32 65, %v724_v7  ;;  %vm599_vm13 = vcmp.lt.s32.totalorder %v480_v13, 64  ;;  %v366_v23 = vadd.s32 32, %v246_v14  ;;  %1904 = vmatpush.msra.mxu2 %v1252_v0  ;;  %v875_v25 = vadd.s32 %v815_v1, %v695_v10 }
  0x64   : > { %1452 = vmatpush.msra.mxu0 %v1251_v9  ;;  %1908 = vmatpush.msra.mxu3 %v1251_v9  ;;  %v860_v26 = vadd.s32 %v800_v6, %v680_v11  ;;  %v630_v27 = vsel %vm629_vm12, %v510_v2, 64  ;;  %v741_v29 = vsub.s32 1, %v2126_v19  ;;  %vm567_vm14 = vcmp.lt.s32.totalorder %v448_v20, 64 }
  0x65   : > { %vm511_vm15 = vcmp.gt.s32.totalorder %v397_v15, 0  ;;  %vm481_vm0 = vcmp.gt.s32.totalorder %v382_v16, 0  ;;  %1907 = vmatpush.msra.mxu2 %v1251_v9  ;;  %1903 = vmatpush.msra.mxu1 %v1252_v0  ;;  %v816_v32 = vmul.u32 65, %v756_v18  ;;  %v600_v33 = vsel %vm599_vm13, %v480_v13, 64  ;;  %v2215_v13 = vld [vmem:[%s1996_s24 + $0x1b8] sm:$0xff] }
  0x66   : > { %1453 = vmatpush.msra.mxu0 %v2122_v17  ;;  %1911 = vmatpush.msra.mxu3 %v2122_v17  ;;  %v844_v35 = vadd.s32 %v784_v22, %v664_v21  ;;  %v696_v36 = vmul.u32 %v630_v27, %v2109_v8  ;;  %v725_v37 = vsub.s32 1, %v2137_v28  ;;  %vm449_vm1 = vcmp.gt.s32.totalorder %v366_v23, 0  ;;  %v280_v22 = vld [vmem:[%s1990_s21 + $0x1c8] sm:$0xff]  ;;  %v265_v27 = vld [vmem:[%s1990_s21 + $0x150] sm:$0xff] }
  0x67   : > { %1910 = vmatpush.msra.mxu2 %v2122_v17  ;;  %1906 = vmatpush.msra.mxu1 %v1251_v9  ;;  %v568_v40 = vsel %vm567_vm14, %v448_v20, 64  ;;  %v512_v41 = vsel %vm511_vm15, %v397_v15, 0  ;;  %v482_v42 = vsel %vm481_vm0, %v382_v16, 0  ;;  %v398_v43 = vadd.s32 32, %v278_v31  ;;  %v323_v15 = vld [vmem:[%s1996_s24 + $0x140] sm:$0xff] }
  0x68   : > { %1454 = vmatpush.msra.mxu0 %v2133_v24  ;;  %1914 = vmatpush.msra.mxu3 %v2133_v24  ;;  %v681_v44 = vmul.u32 %v600_v33, %v2126_v19  ;;  %v801_v45 = vmul.u32 65, %v741_v29  ;;  %v383_v47 = vadd.s32 32, %v263_v34  ;;  %v450_v50 = vsel %vm449_vm1, %v366_v23, 0  ;;  %v307_v20 = vld [vmem:[%s1996_s24 + $0xc0] sm:$0xff] }
  0x69   : > { %1039 = vperm.xlu2 %1939, %v874_v59   ;;  %994 = vperm.xlu1 %1938, %v859_v60   ;;  %v367_v51 = vadd.s32 32, %v247_v39  ;;  %v665_v53 = vmul.u32 %v568_v40, %v2137_v28  ;;  %v785_v54 = vmul.u32 65, %v725_v37  ;;  %vm631_vm2 = vcmp.lt.s32.totalorder %v512_v41, 64  ;;  %v279_v59 = vld [vmem:[%s1990_s21 + $0x1c0] sm:$0xff]  ;;  %v249_v40 = vld [vmem:[%s1990_s21 + $0xd0] sm:$0xff] }
  0x6a   : > { %1455 = vmatpush.msra.mxu0 %v2145_v30  ;;  %1917 = vmatpush.msra.mxu3 %v2145_v30  ;;  %vm601_vm3 = vcmp.lt.s32.totalorder %v482_v42, 64  ;;  %v876_v56 = vadd.s32 %v816_v32, %v696_v36  ;;  %v757_v57 = vsub.s32 1, %v2168_v46  ;;  %vm513_vm4 = vcmp.gt.s32.totalorder %v398_v43, 0  ;;  %v2234_v33 = vld [vmem:[%s1996_s24 + $0x1c0] sm:$0xff] }
  0x6b   : > { %946 = vperm.xlu0 %1937, %v843_v5   ;;  %1913 = vmatpush.msra.mxu2 %v2133_v24  ;;  %v861_v60 = vadd.s32 %v801_v45, %v681_v44  ;;  %v742_v61 = vsub.s32 1, %v2176_v49  ;;  %vm569_vm5 = vcmp.lt.s32.totalorder %v450_v50, 64  ;;  %vm483_vm6 = vcmp.gt.s32.totalorder %v383_v47, 0  ;;  %v248_v5 = vld [vmem:[%s1990_s21 + $0xc8] sm:$0xff]  ;;  %v281_v44 = vld [vmem:[%s1990_s21 + $0x1d0] sm:$0xff] }
  0x6c   : > { %1456 = vmatpush.msra.mxu0 %v2157_v38  ;;  %1920 = vmatpush.msra.mxu3 %v2157_v38  ;;  %v632_v63 = vsel %vm631_vm2, %v512_v41, 64  ;;  %v602_v0 = vsel %vm601_vm3, %v482_v42, 64  ;;  %vm451_vm7 = vcmp.gt.s32.totalorder %v367_v51, 0  ;;  %v845_v1 = vadd.s32 %v785_v54, %v665_v53 }
  0x6d   : > { %1916 = vmatpush.msra.mxu2 %v2145_v30  ;;  %1909 = vmatpush.msra.mxu1 %v2122_v17  ;;  %v726_v2 = vsub.s32 1, %v2192_v58  ;;  %v514_v3 = vsel %vm513_vm4, %v398_v43, 0  ;;  %v399_v4 = vadd.s32 32, %v279_v59  ;;  %v817_v6 = vmul.u32 65, %v757_v57  ;;  %v266_v59 = vld [vmem:[%s1990_s21 + $0x158] sm:$0xff] }
  0x6e   : > { %1457 = vmatpush.msra.mxu0 %v2173_v48  ;;  %1923 = vmatpush.msra.mxu3 %v2173_v48  ;;  %v570_v7 = vsel %vm569_vm5, %v450_v50, 64  ;;  %v484_v8 = vsel %vm483_vm6, %v383_v47, 0  ;;  %v384_v9 = vadd.s32 32, %v264_v62  ;;  %v697_v10 = vmul.u32 %v632_v63, %v2168_v46  ;;  %v308_v50 = vld [vmem:[%s1996_s24 + $0xc8] sm:$0xff] }
  0x6f   : > { %1919 = vmatpush.msra.mxu2 %v2157_v38  ;;  %1912 = vmatpush.msra.mxu1 %v2133_v24  ;;  %v682_v11 = vmul.u32 %v602_v0, %v2176_v49  ;;  %v802_v12 = vmul.u32 65, %v742_v61  ;;  %v452_v14 = vsel %vm451_vm7, %v367_v51, 0  ;;  %vm633_vm8 = vcmp.lt.s32.totalorder %v514_v3, 64  ;;  %v2252_v63 = vld [vmem:[%s1996_s24 + $0x1c8] sm:$0xff] }
  0x70   : > { %1458 = vmatpush.msra.mxu0 %v2187_v55  ;;  %1926 = vmatpush.msra.mxu3 %v2187_v55  ;;  %v368_v16 = vadd.s32 32, %v248_v5  ;;  %v666_v18 = vmul.u32 %v570_v7, %v2192_v58  ;;  %v786_v19 = vmul.u32 65, %v726_v2  ;;  %vm603_vm9 = vcmp.lt.s32.totalorder %v484_v8, 64  ;;  %v250_v7 = vld [vmem:[%s1990_s21 + $0xd8] sm:$0xff] }
  0x71   : > { %1042 = vperm.xlu2 %1939, %v875_v25   ;;  %997 = vperm.xlu1 %1938, %v860_v26   ;;  %vm515_vm10 = vcmp.gt.s32.totalorder %v399_v4, 0  ;;  %v758_v21 = vsub.s32 1, %v2215_v13  ;;  %vm571_vm11 = vcmp.lt.s32.totalorder %v452_v14, 64  ;;  %vm485_vm12 = vcmp.gt.s32.totalorder %v384_v9, 0 }
  0x72   : > { %1922 = vmatpush.msra.mxu2 %v2173_v48  ;;  %1915 = vmatpush.msra.mxu1 %v2145_v30  ;;  %v877_v23 = vadd.s32 %v817_v6, %v697_v10  ;;  %v862_v24 = vadd.s32 %v802_v12, %v682_v11  ;;  %v634_v25 = vsel %vm633_vm8, %v514_v3, 64  ;;  %v743_v26 = vsub.s32 1, %v323_v15  ;;  %v325_v10 = vld [vmem:[%s1996_s24 + $0x150] sm:$0xff] }
  0x73   : > { %949 = vperm.xlu0 %1937, %v844_v35   ;;  %v2181_v52 = vpop.permute.xlu2 %898  ;;  %v604_v28 = vsel %vm603_vm9, %v484_v8, 64  ;;  %v727_v29 = vsub.s32 1, %v307_v20  ;;  %v516_v30 = vsel %vm515_vm10, %v399_v4, 0  ;;  %vm453_vm13 = vcmp.gt.s32.totalorder %v368_v16, 0 }
  0x74   : > { %1925 = vmatpush.msra.mxu2 %v2187_v55  ;;  %1918 = vmatpush.msra.mxu1 %v2157_v38  ;;  %v846_v31 = vadd.s32 %v786_v19, %v666_v18  ;;  %v572_v32 = vsel %vm571_vm11, %v452_v14, 64  ;;  %v486_v34 = vsel %vm485_vm12, %v384_v9, 0  ;;  %v400_v35 = vadd.s32 32, %v280_v22  ;;  %v2239_v38 = vld [vmem:[%s1996_s24 + $0x148] sm:$0xff]  ;;  %v2266_v18 = vld [vmem:[%s1996_s24 + $0xd0] sm:$0xff] }
  0x75   : > { %v698_v36 = vmul.u32 %v634_v25, %v2215_v13  ;;  %v818_v37 = vmul.u32 65, %v758_v21  ;;  %v385_v39 = vadd.s32 32, %v265_v27  ;;  %v683_v41 = vmul.u32 %v604_v28, %v323_v15  ;;  %v267_v25 = vld [vmem:[%s1990_s21 + $0x160] sm:$0xff] }
  0x76   : > { %1921 = vmatpush.msra.mxu1 %v2173_v48  ;;  %v803_v42 = vmul.u32 65, %v743_v26  ;;  %vm635_vm14 = vcmp.lt.s32.totalorder %v516_v30, 64  ;;  %v454_v43 = vsel %vm453_vm13, %v368_v16, 0  ;;  %v667_v45 = vmul.u32 %v572_v32, %v307_v20  ;;  %v251_v32 = vld [vmem:[%s1990_s21 + $0xe0] sm:$0xff] }
  0x77   : > { %v787_v46 = vmul.u32 65, %v727_v29  ;;  %v759_v47 = vsub.s32 1, %v2234_v33  ;;  %vm605_vm15 = vcmp.lt.s32.totalorder %v486_v34, 64  ;;  %v744_v49 = vsub.s32 1, %v2239_v38 }
  0x78   : > { %1924 = vmatpush.msra.mxu1 %v2187_v55  ;;  %vm517_vm0 = vcmp.gt.s32.totalorder %v400_v35, 0  ;;  %v369_v51 = vadd.s32 32, %v249_v40  ;;  %v636_v53 = vsel %vm635_vm14, %v516_v30, 64  ;;  %vm573_vm1 = vcmp.lt.s32.totalorder %v454_v43, 64  ;;  %v236_v40 = vld [vmem:[%s1990_s21 + $0x68] sm:$0xff] }
  0x79   : > { %1045 = vperm.xlu2 %1939, %v876_v56   ;;  %1000 = vperm.xlu1 %1938, %v861_v60   ;;  %vm487_vm2 = vcmp.gt.s32.totalorder %v385_v39, 0  ;;  %v401_v54 = vadd.s32 32, %v281_v44  ;;  %v883_v55 = vlaneseq  ;;  %v878_v56 = vadd.s32 %v818_v37, %v698_v36 }
  0x7a   : > { %v863_v57 = vadd.s32 %v803_v42, %v683_v41  ;;  %v606_v58 = vsel %vm605_vm15, %v486_v34, 64  ;;  %v847_v60 = vadd.s32 %v787_v46, %v667_v45  ;;  %v819_v61 = vmul.u32 65, %v759_v47  ;;  %v341_v34 = vld [vmem:[%s1996_s24 + $0x1d0] sm:$0xff]  ;;  %v326_v42 = vld [vmem:[%s1996_s24 + $0x158] sm:$0xff] }
  0x7b   : > { %952 = vperm.xlu0 %1937, %v845_v1   ;;  %v2221_v17 = vpop.permute.xlu2 %901  ;;  %v728_v62 = vsub.s32 1, %v308_v50  ;;  %v518_v0 = vsel %vm517_vm0, %v400_v35, 0  ;;  %v699_v1 = vmul.u32 %v636_v53, %v2234_v33  ;;  %v574_v2 = vsel %vm573_vm1, %v454_v43, 64  ;;  %v310_v53 = vld [vmem:[%s1996_s24 + $0xd8] sm:$0xff] }
  0x7c   : > { %v488_v3 = vsel %vm487_vm2, %v385_v39, 0  ;;  %vm455_vm3 = vcmp.gt.s32.totalorder %v369_v51, 0  ;;  %v684_v4 = vmul.u32 %v606_v58, %v2239_v38  ;;  %v804_v5 = vmul.u32 65, %v744_v49 }
  0x7d   : > { %vm519_vm4 = vcmp.gt.s32.totalorder %v401_v54, 0  ;;  %v386_v6 = vadd.s32 32, %v266_v59  ;;  %v2257_v8 = vand.u32 127, %v883_v55  ;;  %vm637_vm5 = vcmp.lt.s32.totalorder %v518_v0, 64 }
  0x7e   : > { %v760_v9 = vsub.s32 1, %v2252_v63  ;;  %v668_v11 = vmul.u32 %v574_v2, %v308_v50  ;;  %v788_v12 = vmul.u32 65, %v728_v62  ;;  %vm607_vm6 = vcmp.lt.s32.totalorder %v488_v3, 64 }
  0x7f   : > { %v456_v13 = vsel %vm455_vm3, %v369_v51, 0  ;;  %vm1258_vm7 = vcmask 539648   ;;  %v879_v16 = vadd.s32 %v819_v61, %v699_v1  ;;  %v520_v19 = vsel %vm519_vm4, %v401_v54, 0  ;;  %v237_v1 = vld [vmem:[%s1990_s21 + $0x70] sm:$0xff] }
  0x80   : > { %v370_v20 = vadd.s32 32, %v250_v7  ;;  %v864_v22 = vadd.s32 %v804_v5, %v684_v4  ;;  %vm489_vm8 = vcmp.gt.s32.totalorder %v386_v6, 0  ;;  %v820_v26 = vmul.u32 65, %v760_v9  ;;  %v2294_v4 = vld [vmem:[%s1996_s24 + $0x160] sm:$0xff] }
  0x81   : > { %1048 = vperm.xlu2 %1939, %v877_v23   ;;  %1003 = vperm.xlu1 %1938, %v862_v24   ;;  %v638_v23 = vsel %vm637_vm5, %v518_v0, 64  ;;  %v745_v24 = vsub.s32 1, %v325_v10  ;;  %v608_v27 = vsel %vm607_vm6, %v488_v3, 64  ;;  %vm575_vm10 = vcmp.lt.s32.totalorder %v456_v13, 64  ;;  %v252_v0 = vld [vmem:[%s1990_s21 + $0xe8] sm:$0xff] }
  0x82   : > { %v1950_v28 = vmov 0.0   ;;  %v848_v30 = vadd.s32 %v788_v12, %v668_v11  ;;  %vm639_vm11 = vcmp.lt.s32.totalorder %v520_v19, 64  ;;  %v700_v33 = vmul.u32 %v638_v23, %v2252_v63  ;;  %v311_v11 = vld [vmem:[%s1996_s24 + $0xe0] sm:$0xff] }
  0x83   : > { %955 = vperm.xlu0 %1937, %v846_v31   ;;  %v2246_v48 = vpop.permute.xlu2 %910  ;;  %v729_v31 = vsub.s32 1, %v2266_v18  ;;  %v490_v35 = vsel %vm489_vm8, %v386_v6, 0  ;;  %vm457_vm12 = vcmp.gt.s32.totalorder %v370_v20, 0  ;;  %v387_v36 = vadd.s32 32, %v267_v25 }
  0x84   : > { %v685_v37 = vmul.u32 %v608_v27, %v325_v10  ;;  %v805_v38 = vmul.u32 65, %v745_v24  ;;  %v576_v39 = vsel %vm575_vm10, %v456_v13, 64  ;;  %v640_v41 = vsel %vm639_vm11, %v520_v19, 64  ;;  %v282_v10 = vld [vmem:[%s1990_s21 + $0x1d8] sm:$0xff] }
  0x85   : > { %v371_v43 = vadd.s32 32, %v251_v32  ;;  %v789_v44 = vmul.u32 65, %v729_v31  ;;  %v761_v45 = vsub.s32 1, %v341_v34  ;;  %vm609_vm13 = vcmp.lt.s32.totalorder %v490_v35, 64 }
  0x86   : > { %v458_v46 = vsel %vm457_vm12, %v370_v20, 0  ;;  %v880_v50 = vadd.s32 %v820_v26, %v700_v33  ;;  %v669_v51 = vmul.u32 %v576_v39, %v2266_v18  ;;  %vm491_vm14 = vcmp.gt.s32.totalorder %v387_v36, 0 }
  0x87   : > { %v356_v54 = vadd.s32 32, %v236_v40  ;;  %v865_v55 = vadd.s32 %v805_v38, %v685_v37  ;;  %vm577_vm0 = vcmp.lt.s32.totalorder %v458_v46, 64  ;;  %vm459_vm1 = vcmp.gt.s32.totalorder %v371_v43, 0 }
  0x88   : > { %v821_v61 = vmul.u32 65, %v761_v45  ;;  %v730_v62 = vsub.s32 1, %v310_v53  ;;  %v492_v63 = vsel %vm491_vm14, %v387_v36, 0  ;;  %v849_v3 = vadd.s32 %v789_v44, %v669_v51  ;;  %v297_v44 = vld [vmem:[%s1996_s24 + $0x70] sm:$0xff] }
  0x89   : > { %1051 = vperm.xlu2 %1939, %v878_v56   ;;  %1006 = vperm.xlu1 %1938, %v863_v57   ;;  %v701_v56 = vmul.u32 %v640_v41, %v341_v34  ;;  %v746_v57 = vsub.s32 1, %v326_v42  ;;  %vm429_vm3 = vcmp.gt.s32.totalorder %v356_v54, 0  ;;  %v578_v7 = vsel %vm577_vm0, %v458_v46, 64 }
  0x8a   : > { %v460_v9 = vsel %vm459_vm1, %v371_v43, 0  ;;  %vm611_vm4 = vcmp.lt.s32.totalorder %v492_v63, 64  ;;  %v372_v12 = vadd.s32 32, %v252_v0  ;;  %v357_v13 = vadd.s32 32, %v237_v1  ;;  %v312_v43 = vld [vmem:[%s1996_s24 + $0xe8] sm:$0xff] }
  0x8b   : > { %958 = vperm.xlu0 %1937, %v847_v60   ;;  %v2261_v14 = vpop.permute.xlu2 %919  ;;  %v2263_v15 = vpop.permute.xlu1 %892  ;;  %v610_v60 = vsel %vm609_vm13, %v490_v35, 64  ;;  %v806_v6 = vmul.u32 65, %v746_v57  ;;  %v790_v18 = vmul.u32 65, %v730_v62  ;;  %v747_v19 = vsub.s32 1, %v2294_v4 }
  0x8c   : > { %v686_v5 = vmul.u32 %v610_v60, %v326_v42  ;;  %v430_v20 = vsel %vm429_vm3, %v356_v54, 0  ;;  %vm1067_vm5 = vcmp.eq.s32.totalorder %v2257_v8, %v2263_v15  ;;  %v670_v23 = vmul.u32 %v578_v7, %v310_v53  ;;  %v342_v54 = vld [vmem:[%s1996_s24 + $0x1d8] sm:$0xff] }
  0x8d   : > { %v887_v21 = vpop.permute.xlu0 %886  ;;  %vm579_vm6 = vcmp.lt.s32.totalorder %v460_v9, 64  ;;  %v402_v24 = vadd.s32 32, %v282_v10  ;;  %v612_v26 = vsel %vm611_vm4, %v492_v63, 64  ;;  %v731_v27 = vsub.s32 1, %v311_v11 }
  0x8e   : > { %vm1065_vm9 = vcmp.eq.s32.totalorder %v2257_v8, %v887_v21  ;;  %v866_v25 = vadd.s32 %v806_v6, %v686_v5  ;;  %vm461_vm10 = vcmp.gt.s32.totalorder %v372_v12, 0  ;;  %vm431_vm11 = vcmp.gt.s32.totalorder %v357_v13, 0 }
  0x8f   : > { %v1777_v29 = vsel %vm1065_vm9, 1.0, %v1950_v28  ;;  %vm549_vm9 = vcmp.lt.s32.totalorder %v430_v20, 64  ;;  %v807_v32 = vmul.u32 65, %v747_v19  ;;  %v580_v33 = vsel %vm579_vm6, %v460_v9, 64 }
  0x90   : > { %1838 = vmatmul.msk.f32.vlgmr.msra.gmra.mxu0 %vm1258_vm7, %v1777_v29  ;;  %v296_v29 = vld [vmem:[%s1996_s24 + $0x68] sm:$0xff]  ;;  %v1779_v34 = vsel %vm1067_vm5, 1.0, %v1950_v28  ;;  %v850_v35 = vadd.s32 %v790_v18, %v670_v23  ;;  %vm521_vm12 = vcmp.gt.s32.totalorder %v402_v24, 0  ;;  %v687_v37 = vmul.u32 %v612_v26, %v2294_v4 }
  0x91   : > { %1054 = vperm.xlu2 %1939, %v879_v16   ;;  %1009 = vperm.xlu1 %1938, %v864_v22   ;;  %v881_v16 = vadd.s32 %v821_v61, %v701_v56  ;;  %v716_v36 = vsub.s32 1, %v296_v29  ;;  %v550_v38 = vsel %vm549_vm9, %v430_v20, 64  ;;  %v462_v39 = vsel %vm461_vm10, %v372_v12, 0 }
  0x92   : > { %v432_v40 = vsel %vm431_vm11, %v357_v13, 0  ;;  %v671_v41 = vmul.u32 %v580_v33, %v311_v11  ;;  %v791_v42 = vmul.u32 65, %v731_v27  ;;  %v522_v45 = vsel %vm521_vm12, %v402_v24, 0 }
  0x93   : > { %961 = vperm.xlu0 %1937, %v848_v30   ;;  %v1022_v47 = vpop.permute.xlu2 %1021  ;;  %v2281_v49 = vpop.permute.xlu1 %895  ;;  %vm581_vm13 = vcmp.lt.s32.totalorder %v462_v39, 64  ;;  %vm551_vm14 = vcmp.lt.s32.totalorder %v432_v40, 64  ;;  %v867_v51 = vadd.s32 %v807_v32, %v687_v37  ;;  %v732_v53 = vsub.s32 1, %v312_v43 }
  0x94   : > { %vm1110_vm15 = vcmp.eq.s32.totalorder %v2257_v8, %v1022_v47  ;;  %v656_v47 = vmul.u32 %v550_v38, %v296_v29  ;;  %v851_v57 = vadd.s32 %v791_v42, %v671_v41  ;;  %vm641_vm1 = vcmp.lt.s32.totalorder %v522_v45, 64 }
  0x95   : > { %v1822_v58 = vsel %vm1110_vm15, 1.0, %v1950_v28  ;;  %v890_v59 = vpop.permute.xlu0 %889  ;;  %vm1068_vm15 = vcmp.eq.s32.totalorder %v2257_v8, %v2281_v49  ;;  %v552_v60 = vsel %vm551_vm14, %v432_v40, 64  ;;  %v762_v49 = vsub.s32 1, %v342_v54 }
  0x96   : > { %vm1066_vm2 = vcmp.eq.s32.totalorder %v2257_v8, %v890_v59  ;;  %1883 = vmatmul.msk.f32.vlgmr.msra.gmra.mxu3 %vm1258_vm7, %v1822_v58  ;;  %v717_v58 = vsub.s32 1, %v297_v44  ;;  %v582_v59 = vsel %vm581_vm13, %v462_v39, 64  ;;  %v1780_v61 = vsel %vm1068_vm15, 1.0, %v1950_v28 }
  0x97   : > { %v1778_v2 = vsel %vm1066_vm2, 1.0, %v1950_v28  ;;  %v642_v63 = vsel %vm641_vm1, %v522_v45, 64  ;;  %v672_v0 = vmul.u32 %v582_v59, %v312_v43  ;;  %v792_v1 = vmul.u32 65, %v732_v53 }
  0x98   : > { %1839 = vmatmul.msk.f32.gmra.mxu0 %vm1258_vm7, %v1778_v2  ;;  %v657_v2 = vmul.u32 %v552_v60, %v297_v44  ;;  %v702_v6 = vmul.u32 %v642_v63, %v342_v54  ;;  %v822_v7 = vmul.u32 65, %v762_v49  ;;  %vm1069_vm2 = vcmp.eq.s32.totalorder %v2257_v8, %v2181_v52 }
  0x99   : > { %1057 = vperm.xlu2 %1939, %v880_v50   ;;  %1012 = vperm.xlu1 %1938, %v865_v55   ;;  %v776_v50 = vmul.u32 65, %v716_v36  ;;  %v852_v12 = vadd.s32 %v792_v1, %v672_v0  ;;  %vm1070_vm5 = vcmp.eq.s32.totalorder %v2257_v8, %v2221_v17 }
  0x9a   : > { %v882_v18 = vadd.s32 %v822_v7, %v702_v6  ;;  %v1782_v24 = vsel %vm1070_vm5, 1.0, %v1950_v28 }
  0x9b   : > { %964 = vperm.xlu0 %1937, %v849_v3   ;;  %v1025_v21 = vpop.permute.xlu2 %1024  ;;  %v2305_v22 = vpop.permute.xlu1 %907  ;;  %v836_v62 = vadd.s32 %v776_v50, %v656_v47  ;;  %v777_v3 = vmul.u32 65, %v717_v58 }
  0x9c   : > { %vm1111_vm8 = vcmp.eq.s32.totalorder %v2257_v8, %v1025_v21  ;;  %vm1072_vm14 = vcmp.eq.s32.totalorder %v2257_v8, %v2305_v22 }
  0x9d   : > { %v1823_v30 = vsel %vm1111_vm8, 1.0, %v1950_v28  ;;  %v2311_v31 = vpop.permute.xlu0 %904  ;;  %v837_v13 = vadd.s32 %v777_v3, %v657_v2  ;;  %v1784_v38 = vsel %vm1072_vm14, 1.0, %v1950_v28 }
  0x9e   : > { %1884 = vmatmul.msk.f32.gmra.mxu3 %vm1258_vm7, %v1823_v30  ;;  %vm1071_vm10 = vcmp.eq.s32.totalorder %v2257_v8, %v2311_v31 }
  0x9f   : > { %v1783_v32 = vsel %vm1071_vm10, 1.0, %v1950_v28 }
  0xa0   : > { %1840 = vmatmul.msk.f32.gmra.mxu0 %vm1258_vm7, %v1779_v34 }
  0xa1   : > { %1060 = vperm.xlu2 %1939, %v881_v16   ;;  %1015 = vperm.xlu1 %1938, %v866_v25   ;;  %v1781_v16 = vsel %vm1069_vm2, 1.0, %v1950_v28  ;;  %vm1073_vm2 = vcmp.eq.s32.totalorder %v2257_v8, %v2246_v48 }
  0xa2   : > { %v1785_v44 = vsel %vm1073_vm2, 1.0, %v1950_v28 }
  0xa3   : > { %967 = vperm.xlu0 %1937, %v850_v35   ;;  %v1028_v15 = vpop.permute.xlu2 %1027  ;;  %v2322_v46 = vpop.permute.xlu1 %916 }
  0xa4   : > { %vm1112_vm0 = vcmp.eq.s32.totalorder %v2257_v8, %v1028_v15 }
  0xa5   : > { %v1824_v55 = vsel %vm1112_vm0, 1.0, %v1950_v28  ;;  %v2329_v56 = vpop.permute.xlu0 %913 }
  0xa6   : > { %1885 = vmatmul.msk.f32.gmra.mxu3 %vm1258_vm7, %v1824_v55 }
  0xa8   : > { %1841 = vmatmul.msk.f32.gmra.mxu0 %vm1258_vm7, %v1780_v61 }
  0xa9   : > { %1018 = vperm.xlu2 %1939, %v867_v51   ;;  %970 = vperm.xlu1 %1938, %v851_v57  }
  0xab   : > { %925 = vperm.xlu0 %1937, %v836_v62   ;;  %v1031_v4 = vpop.permute.xlu2 %1030  ;;  %v977_v5 = vpop.permute.xlu1 %976 }
  0xac   : > { %vm1113_vm3 = vcmp.eq.s32.totalorder %v2257_v8, %v1031_v4  ;;  %vm1095_vm4 = vcmp.eq.s32.totalorder %v2257_v8, %v977_v5 }
  0xad   : > { %v1825_v9 = vsel %vm1113_vm3, 1.0, %v1950_v28  ;;  %v1807_v10 = vsel %vm1095_vm4, 1.0, %v1950_v28  ;;  %v2340_v11 = vpop.permute.xlu0 %922 }
  0xae   : > { %1868 = vmatmul.msk.f32.vlgmr.msra.gmra.mxu2 %vm1258_vm7, %v1807_v10  ;;  %1886 = vmatmul.msk.f32.gmra.mxu3 %vm1258_vm7, %v1825_v9 }
  0xb0   : > { %1842 = vmatmul.msk.f32.gmra.mxu0 %vm1258_vm7, %v1781_v16 }
  0xb1   : > { %973 = vperm.xlu2 %1939, %v852_v12   ;;  %928 = vperm.xlu1 %1938, %v837_v13  }
  0xb3   : > { %1063 = vperm.xlu0 %1937, %v882_v18   ;;  %v1034_v52 = vpop.permute.xlu2 %1033  ;;  %v980_v19 = vpop.permute.xlu1 %979 }
  0xb4   : > { %vm1114_vm6 = vcmp.eq.s32.totalorder %v2257_v8, %v1034_v52  ;;  %vm1096_vm8 = vcmp.eq.s32.totalorder %v2257_v8, %v980_v19 }
  0xb5   : > { %v1826_v20 = vsel %vm1114_vm6, 1.0, %v1950_v28  ;;  %v1808_v21 = vsel %vm1096_vm8, 1.0, %v1950_v28  ;;  %v932_v23 = vpop.permute.xlu0 %931  ;;  %vm1074_vm6 = vcmp.eq.s32.totalorder %v2257_v8, %v2329_v56 }
  0xb6   : > { %vm1080_vm9 = vcmp.eq.s32.totalorder %v2257_v8, %v932_v23  ;;  %1869 = vmatmul.msk.f32.gmra.mxu2 %vm1258_vm7, %v1808_v21  ;;  %1887 = vmatmul.msk.f32.gmra.mxu3 %vm1258_vm7, %v1826_v20  ;;  %v1786_v53 = vsel %vm1074_vm6, 1.0, %v1950_v28 }
  0xb7   : > { %v1792_v25 = vsel %vm1080_vm9, 1.0, %v1950_v28 }
  0xb8   : > { %1843 = vmatmul.msk.f32.gmra.mxu0 %vm1258_vm7, %v1782_v24  ;;  %1853 = vmatmul.msk.f32.vlgmr.msra.gmra.mxu1 %vm1258_vm7, %v1792_v25 }
  0xbb   : > { %v1037_v17 = vpop.permute.xlu2 %1036  ;;  %v983_v26 = vpop.permute.xlu1 %982 }
  0xbc   : > { %vm1115_vm11 = vcmp.eq.s32.totalorder %v2257_v8, %v1037_v17  ;;  %vm1097_vm12 = vcmp.eq.s32.totalorder %v2257_v8, %v983_v26 }
  0xbd   : > { %v1827_v27 = vsel %vm1115_vm11, 1.0, %v1950_v28  ;;  %v1809_v29 = vsel %vm1097_vm12, 1.0, %v1950_v28  ;;  %v935_v30 = vpop.permute.xlu0 %934  ;;  %vm1075_vm11 = vcmp.eq.s32.totalorder %v2257_v8, %v2322_v46 }
  0xbe   : > { %vm1081_vm13 = vcmp.eq.s32.totalorder %v2257_v8, %v935_v30  ;;  %1870 = vmatmul.msk.f32.gmra.mxu2 %vm1258_vm7, %v1809_v29  ;;  %1888 = vmatmul.msk.f32.gmra.mxu3 %vm1258_vm7, %v1827_v27  ;;  %v1787_v60 = vsel %vm1075_vm11, 1.0, %v1950_v28  ;;  %v2477_v29 = vld [vmem:[%s2701_s3] ss:$0 sm:$0xff] }
  0xbf   : > { %v1793_v33 = vsel %vm1081_vm13, 1.0, %v1950_v28 }
  0xc0   : > { %1844 = vmatmul.msk.f32.gmra.mxu0 %vm1258_vm7, %v1783_v32  ;;  %1854 = vmatmul.msk.f32.gmra.mxu1 %vm1258_vm7, %v1793_v33 }
  0xc3   : > { %v1040_v31 = vpop.permute.xlu2 %1039  ;;  %v986_v34 = vpop.permute.xlu1 %985 }
  0xc4   : > { %vm1116_vm15 = vcmp.eq.s32.totalorder %v2257_v8, %v1040_v31  ;;  %vm1098_vm0 = vcmp.eq.s32.totalorder %v2257_v8, %v986_v34 }
  0xc5   : > { %v1828_v35 = vsel %vm1116_vm15, 1.0, %v1950_v28  ;;  %v1810_v36 = vsel %vm1098_vm0, 1.0, %v1950_v28  ;;  %v938_v37 = vpop.permute.xlu0 %937  ;;  %vm1076_vm15 = vcmp.eq.s32.totalorder %v2257_v8, %v2261_v14 }
  0xc6   : > { %vm1082_vm1 = vcmp.eq.s32.totalorder %v2257_v8, %v938_v37  ;;  %1871 = vmatmul.msk.f32.gmra.mxu2 %vm1258_vm7, %v1810_v36  ;;  %1889 = vmatmul.msk.f32.gmra.mxu3 %vm1258_vm7, %v1828_v35  ;;  %v1788_v1 = vsel %vm1076_vm15, 1.0, %v1950_v28 }
  0xc7   : > { %v1794_v39 = vsel %vm1082_vm1, 1.0, %v1950_v28 }
  0xc8   : > { %1845 = vmatmul.msk.f32.gmra.mxu0 %vm1258_vm7, %v1784_v38  ;;  %1855 = vmatmul.msk.f32.gmra.mxu1 %vm1258_vm7, %v1794_v39 }
  0xcb   : > { %v1043_v22 = vpop.permute.xlu2 %1042  ;;  %v989_v40 = vpop.permute.xlu1 %988 }
  0xcc   : > { %vm1117_vm3 = vcmp.eq.s32.totalorder %v2257_v8, %v1043_v22  ;;  %vm1099_vm4 = vcmp.eq.s32.totalorder %v2257_v8, %v989_v40 }
  0xcd   : > { %v1829_v41 = vsel %vm1117_vm3, 1.0, %v1950_v28  ;;  %v1811_v42 = vsel %vm1099_vm4, 1.0, %v1950_v28  ;;  %v941_v43 = vpop.permute.xlu0 %940  ;;  %vm1077_vm3 = vcmp.eq.s32.totalorder %v2257_v8, %v2340_v11 }
  0xce   : > { %vm1083_vm5 = vcmp.eq.s32.totalorder %v2257_v8, %v941_v43  ;;  %1872 = vmatmul.msk.f32.gmra.mxu2 %vm1258_vm7, %v1811_v42  ;;  %1890 = vmatmul.msk.f32.gmra.mxu3 %vm1258_vm7, %v1829_v41  ;;  %v1789_v7 = vsel %vm1077_vm3, 1.0, %v1950_v28 }
  0xcf   : > { %v1795_v45 = vsel %vm1083_vm5, 1.0, %v1950_v28 }
  0xd0   : > { %1846 = vmatmul.msk.f32.gmra.mxu0 %vm1258_vm7, %v1785_v44  ;;  %1856 = vmatmul.msk.f32.gmra.mxu1 %vm1258_vm7, %v1795_v45 }
  0xd3   : > { %v1046_v48 = vpop.permute.xlu2 %1045  ;;  %v992_v15 = vpop.permute.xlu1 %991 }
  0xd4   : > { %vm1118_vm8 = vcmp.eq.s32.totalorder %v2257_v8, %v1046_v48  ;;  %vm1100_vm9 = vcmp.eq.s32.totalorder %v2257_v8, %v992_v15 }
  0xd5   : > { %v1830_v47 = vsel %vm1118_vm8, 1.0, %v1950_v28  ;;  %v1812_v50 = vsel %vm1100_vm9, 1.0, %v1950_v28  ;;  %v944_v51 = vpop.permute.xlu0 %943 }
  0xd6   : > { %vm1084_vm10 = vcmp.eq.s32.totalorder %v2257_v8, %v944_v51  ;;  %1873 = vmatmul.msk.f32.gmra.mxu2 %vm1258_vm7, %v1812_v50  ;;  %1891 = vmatmul.msk.f32.gmra.mxu3 %vm1258_vm7, %v1830_v47 }
  0xd7   : > { %v1796_v54 = vsel %vm1084_vm10, 1.0, %v1950_v28 }
  0xd8   : > { %1847 = vmatmul.msk.f32.gmra.mxu0 %vm1258_vm7, %v1786_v53  ;;  %1857 = vmatmul.msk.f32.gmra.mxu1 %vm1258_vm7, %v1796_v54 }
  0xdb   : > { %v1049_v55 = vpop.permute.xlu2 %1048  ;;  %v995_v56 = vpop.permute.xlu1 %994 }
  0xdc   : > { %vm1119_vm12 = vcmp.eq.s32.totalorder %v2257_v8, %v1049_v55  ;;  %vm1101_vm13 = vcmp.eq.s32.totalorder %v2257_v8, %v995_v56 }
  0xdd   : > { %v1831_v57 = vsel %vm1119_vm12, 1.0, %v1950_v28  ;;  %v1813_v58 = vsel %vm1101_vm13, 1.0, %v1950_v28  ;;  %v947_v59 = vpop.permute.xlu0 %946 }
  0xde   : > { %vm1085_vm14 = vcmp.eq.s32.totalorder %v2257_v8, %v947_v59  ;;  %1874 = vmatmul.msk.f32.gmra.mxu2 %vm1258_vm7, %v1813_v58  ;;  %1892 = vmatmul.msk.f32.gmra.mxu3 %vm1258_vm7, %v1831_v57 }
  0xdf   : > { %v1797_v61 = vsel %vm1085_vm14, 1.0, %v1950_v28 }
  0xe0   : > { %1848 = vmatmul.msk.f32.gmra.mxu0 %vm1258_vm7, %v1787_v60  ;;  %1858 = vmatmul.msk.f32.gmra.mxu1 %vm1258_vm7, %v1797_v61 }
  0xe3   : > { %v1052_v46 = vpop.permute.xlu2 %1051  ;;  %v998_v62 = vpop.permute.xlu1 %997 }
  0xe4   : > { %vm1120_vm0 = vcmp.eq.s32.totalorder %v2257_v8, %v1052_v46  ;;  %vm1102_vm1 = vcmp.eq.s32.totalorder %v2257_v8, %v998_v62 }
  0xe5   : > { %v1832_v49 = vsel %vm1120_vm0, 1.0, %v1950_v28  ;;  %v1814_v63 = vsel %vm1102_vm1, 1.0, %v1950_v28  ;;  %v950_v0 = vpop.permute.xlu0 %949  ;;  %vm1640_vm1 = vcmask 130048  }
  0xe6   : > { %vm1086_vm2 = vcmp.eq.s32.totalorder %v2257_v8, %v950_v0  ;;  %1875 = vmatmul.msk.f32.gmra.mxu2 %vm1258_vm7, %v1814_v63  ;;  %1893 = vmatmul.msk.f32.gmra.mxu3 %vm1258_vm7, %v1832_v49 }
  0xe7   : > { %v1798_v2 = vsel %vm1086_vm2, 1.0, %v1950_v28 }
  0xe8   : > { %1849 = vmatmul.msk.f32.gmra.mxu0 %vm1258_vm7, %v1788_v1  ;;  %1859 = vmatmul.msk.f32.gmra.mxu1 %vm1258_vm7, %v1798_v2 }
  0xeb   : > { %v1055_v14 = vpop.permute.xlu2 %1054  ;;  %v1001_v3 = vpop.permute.xlu1 %1000 }
  0xec   : > { %vm1121_vm4 = vcmp.eq.s32.totalorder %v2257_v8, %v1055_v14  ;;  %vm1103_vm5 = vcmp.eq.s32.totalorder %v2257_v8, %v1001_v3 }
  0xed   : > { %v1833_v4 = vsel %vm1121_vm4, 1.0, %v1950_v28  ;;  %v1815_v5 = vsel %vm1103_vm5, 1.0, %v1950_v28  ;;  %v953_v6 = vpop.permute.xlu0 %952 }
  0xee   : > { %vm1087_vm6 = vcmp.eq.s32.totalorder %v2257_v8, %v953_v6  ;;  %1876 = vmatmul.msk.f32.gmra.mxu2 %vm1258_vm7, %v1815_v5  ;;  %1894 = vmatmul.msk.f32.gmra.mxu3 %vm1258_vm7, %v1833_v4 }
  0xef   : > { %v1799_v9 = vsel %vm1087_vm6, 1.0, %v1950_v28 }
  0xf0   : > { %1850 = vmatmul.msk.f32.gmra.mxu0 %vm1258_vm7, %v1789_v7  ;;  %1860 = vmatmul.msk.f32.gmra.mxu1 %vm1258_vm7, %v1799_v9 }
  0xf3   : > { %v1058_v10 = vpop.permute.xlu2 %1057  ;;  %v1004_v11 = vpop.permute.xlu1 %1003 }
  0xf4   : > { %vm1122_vm8 = vcmp.eq.s32.totalorder %v2257_v8, %v1058_v10  ;;  %vm1104_vm9 = vcmp.eq.s32.totalorder %v2257_v8, %v1004_v11 }
  0xf5   : > { %v1834_v12 = vsel %vm1122_vm8, 1.0, %v1950_v28  ;;  %v1816_v13 = vsel %vm1104_vm9, 1.0, %v1950_v28  ;;  %v956_v16 = vpop.permute.xlu0 %955 }
  0xf6   : > { %vm1088_vm10 = vcmp.eq.s32.totalorder %v2257_v8, %v956_v16  ;;  %1877 = vmatmul.msk.f32.gmra.mxu2 %vm1258_vm7, %v1816_v13  ;;  %1895 = vmatmul.msk.f32.gmra.mxu3 %vm1258_vm7, %v1834_v12 }
  0xf7   : > { %v1800_v18 = vsel %vm1088_vm10, 1.0, %v1950_v28 }
  0xf8   : > { %1861 = vmatmul.msk.f32.gmra.mxu1 %vm1258_vm7, %v1800_v18 }
  0xfb   : > { %v1061_v52 = vpop.permute.xlu2 %1060  ;;  %v1007_v19 = vpop.permute.xlu1 %1006 }
  0xfc   : > { %vm1123_vm11 = vcmp.eq.s32.totalorder %v2257_v8, %v1061_v52  ;;  %vm1105_vm12 = vcmp.eq.s32.totalorder %v2257_v8, %v1007_v19 }
  0xfd   : > { %v1835_v20 = vsel %vm1123_vm11, 1.0, %v1950_v28  ;;  %v1817_v21 = vsel %vm1105_vm12, 1.0, %v1950_v28  ;;  %v959_v23 = vpop.permute.xlu0 %958 }
  0xfe   : > { %vm1089_vm13 = vcmp.eq.s32.totalorder %v2257_v8, %v959_v23  ;;  %1878 = vmatmul.msk.f32.gmra.mxu2 %vm1258_vm7, %v1817_v21  ;;  %1896 = vmatmul.msk.f32.gmra.mxu3 %vm1258_vm7, %v1835_v20 }
  0xff   : > { %v1801_v24 = vsel %vm1089_vm13, 1.0, %v1950_v28 }
 0x100   : > { %1862 = vmatmul.msk.f32.gmra.mxu1 %vm1258_vm7, %v1801_v24 }
 0x103   : > { %v1010_v25 = vpop.permute.xlu1 %1009  ;;  %v1019_v40 = vpop.permute.xlu2 %1018 }
 0x104   : > { %vm1106_vm14 = vcmp.eq.s32.totalorder %v2257_v8, %v1010_v25  ;;  %vm1109_vm5 = vcmp.eq.s32.totalorder %v2257_v8, %v1019_v40 }
 0x105   : > { %v1818_v17 = vsel %vm1106_vm14, 1.0, %v1950_v28  ;;  %v962_v26 = vpop.permute.xlu0 %961  ;;  %v1821_v45 = vsel %vm1109_vm5, 1.0, %v1950_v28 }
 0x106   : > { %vm1090_vm15 = vcmp.eq.s32.totalorder %v2257_v8, %v962_v26  ;;  %1879 = vmatmul.msk.f32.gmra.mxu2 %vm1258_vm7, %v1818_v17 }
 0x107   : > { %v1802_v27 = vsel %vm1090_vm15, 1.0, %v1950_v28 }
 0x108   : > { %1863 = vmatmul.msk.f32.gmra.mxu1 %vm1258_vm7, %v1802_v27 }
 0x10b   : > { %v1013_v30 = vpop.permute.xlu1 %1012  ;;  %v974_v53 = vpop.permute.xlu2 %973 }
 0x10c   : > { %vm1107_vm0 = vcmp.eq.s32.totalorder %v2257_v8, %v1013_v30  ;;  %vm1094_vm9 = vcmp.eq.s32.totalorder %v2257_v8, %v974_v53 }
 0x10d   : > { %v1460_v32 = vpop.f32.mrf.mxu0  ;;  %v1819_v33 = vsel %vm1107_vm0, 1.0, %v1950_v28  ;;  %v965_v34 = vpop.permute.xlu0 %964  ;;  %v1806_v61 = vsel %vm1094_vm9, 1.0, %v1950_v28 }
 0x10e   : > { %v1461_v31 = vadd.f32 %v2477_v29, %v1460_v32  ;;  %vm1091_vm2 = vcmp.eq.s32.totalorder %v2257_v8, %v965_v34  ;;  %1880 = vmatmul.msk.f32.gmra.mxu2 %vm1258_vm7, %v1819_v33 }
 0x10f   : > { %v1803_v35 = vsel %vm1091_vm2, 1.0, %v1950_v28 }
 0x110   : > { %1641 = vst.msk [vmem:[%s2484_s23] sm:$0xff] %vm1640_vm1, %v1461_v31  ;;  %1864 = vmatmul.msk.f32.gmra.mxu1 %vm1258_vm7, %v1803_v35 }
 0x113   : > { %v1016_v36 = vpop.permute.xlu1 %1015 }
 0x114   : > { %vm1108_vm3 = vcmp.eq.s32.totalorder %v2257_v8, %v1016_v36 }
 0x115   : > { %v1820_v37 = vsel %vm1108_vm3, 1.0, %v1950_v28  ;;  %v1463_v38 = vpop.f32.mrf.mxu0  ;;  %v968_v39 = vpop.permute.xlu0 %967 }
 0x116   : > { %v1464_v22 = vadd.f32 %v2477_v29, %v1463_v38  ;;  %vm1092_vm4 = vcmp.eq.s32.totalorder %v2257_v8, %v968_v39  ;;  %1881 = vmatmul.msk.f32.gmra.mxu2 %vm1258_vm7, %v1820_v37 }
 0x117   : > { %v1804_v41 = vsel %vm1092_vm4, 1.0, %v1950_v28 }
 0x118   : > { %1642 = vst.msk [vmem:[%s2484_s23 + $0x8] sm:$0xff] %vm1640_vm1, %v1464_v22  ;;  %1865 = vmatmul.msk.f32.gmra.mxu1 %vm1258_vm7, %v1804_v41 }
 0x119   : > { %v1595_v42 = vpop.f32.mrf.mxu3 }
 0x11a   : > { %v1596_v43 = vadd.f32 %v2477_v29, %v1595_v42 }
 0x11b   : > { %v971_v44 = vpop.permute.xlu1 %970 }
 0x11c   : > { %1686 = vst.msk [vmem:[%s2484_s23 + $0x168] sm:$0xff] %vm1640_vm1, %v1596_v43  ;;  %vm1093_vm6 = vcmp.eq.s32.totalorder %v2257_v8, %v971_v44 }
 0x11d   : > { %v1805_v48 = vsel %vm1093_vm6, 1.0, %v1950_v28  ;;  %v1466_v15 = vpop.f32.mrf.mxu0  ;;  %v926_v47 = vpop.permute.xlu0 %925 }
 0x11e   : > { %v1467_v50 = vadd.f32 %v2477_v29, %v1466_v15  ;;  %vm1078_vm8 = vcmp.eq.s32.totalorder %v2257_v8, %v926_v47  ;;  %1882 = vmatmul.msk.f32.gmra.mxu2 %vm1258_vm7, %v1821_v45 }
 0x11f   : > { %v1790_v51 = vsel %vm1078_vm8, 1.0, %v1950_v28 }
 0x120   : > { %1643 = vst.msk [vmem:[%s2484_s23 + $0x10] sm:$0xff] %vm1640_vm1, %v1467_v50  ;;  %1851 = vmatmul.msk.f32.gmra.mxu0 %vm1258_vm7, %v1790_v51  ;;  %1866 = vmatmul.msk.f32.gmra.mxu1 %vm1258_vm7, %v1805_v48 }
 0x121   : > { %v1598_v54 = vpop.f32.mrf.mxu3 }
 0x122   : > { %v1599_v55 = vadd.f32 %v2477_v29, %v1598_v54 }
 0x123   : > { %v929_v56 = vpop.permute.xlu1 %928 }
 0x124   : > { %1687 = vst.msk [vmem:[%s2484_s23 + $0x170] sm:$0xff] %vm1640_vm1, %v1599_v55  ;;  %vm1079_vm10 = vcmp.eq.s32.totalorder %v2257_v8, %v929_v56 }
 0x125   : > { %v1791_v57 = vsel %vm1079_vm10, 1.0, %v1950_v28  ;;  %v1469_v58 = vpop.f32.mrf.mxu0  ;;  %v1064_v59 = vpop.permute.xlu0 %1063 }
 0x126   : > { %v1470_v60 = vadd.f32 %v2477_v29, %v1469_v58  ;;  %vm1124_vm11 = vcmp.eq.s32.totalorder %v2257_v8, %v1064_v59 }
 0x127   : > { %v1836_v46 = vsel %vm1124_vm11, 1.0, %v1950_v28 }
 0x128   : > { %1644 = vst.msk [vmem:[%s2484_s23 + $0x18] sm:$0xff] %vm1640_vm1, %v1470_v60  ;;  %1852 = vmatmul.msk.f32.gmra.mxu0 %vm1258_vm7, %v1791_v57  ;;  %1867 = vmatmul.msk.f32.gmra.mxu1 %vm1258_vm7, %v1806_v61 }
 0x129   : > { %1897 = vmatmul.msk.f32.gmra.mxu3 %vm1258_vm7, %v1836_v46  ;;  %v1601_v62 = vpop.f32.mrf.mxu3 }
 0x12a   : > { %v1602_v49 = vadd.f32 %v2477_v29, %v1601_v62 }
 0x12c   : > { %1688 = vst.msk [vmem:[%s2484_s23 + $0x178] sm:$0xff] %vm1640_vm1, %v1602_v49 }
 0x12d   : > { %v1472_v8 = vpop.f32.mrf.mxu0 }
 0x12e   : > { %v1473_v63 = vadd.f32 %v2477_v29, %v1472_v8 }
 0x130   : > { %1645 = vst.msk [vmem:[%s2484_s23 + $0x20] sm:$0xff] %vm1640_vm1, %v1473_v63 }
 0x131   : > { %v1550_v28 = vpop.f32.mrf.mxu2  ;;  %v1604_v0 = vpop.f32.mrf.mxu3 }
 0x132   : > { %v1551_v1 = vadd.f32 %v2477_v29, %v1550_v28  ;;  %v1605_v2 = vadd.f32 %v2477_v29, %v1604_v0 }
 0x134   : > { %1671 = vst.msk [vmem:[%s2484_s23 + $0xf0] sm:$0xff] %vm1640_vm1, %v1551_v1 }
 0x135   : > { %1689 = vst.msk [vmem:[%s2484_s23 + $0x180] sm:$0xff] %vm1640_vm1, %v1605_v2  ;;  %v1475_v14 = vpop.f32.mrf.mxu0  ;;  %v1505_v3 = vpop.f32.mrf.mxu1 }
 0x136   : > { %v1476_v4 = vadd.f32 %v2477_v29, %v1475_v14  ;;  %v1506_v5 = vadd.f32 %v2477_v29, %v1505_v3 }
 0x138   : > { %1646 = vst.msk [vmem:[%s2484_s23 + $0x28] sm:$0xff] %vm1640_vm1, %v1476_v4 }
 0x139   : > { %1656 = vst.msk [vmem:[%s2484_s23 + $0x78] sm:$0xff] %vm1640_vm1, %v1506_v5  ;;  %v1553_v6 = vpop.f32.mrf.mxu2  ;;  %v1607_v7 = vpop.f32.mrf.mxu3 }
 0x13a   : > { %v1554_v9 = vadd.f32 %v2477_v29, %v1553_v6  ;;  %v1608_v10 = vadd.f32 %v2477_v29, %v1607_v7 }
 0x13c   : > { %1672 = vst.msk [vmem:[%s2484_s23 + $0xf8] sm:$0xff] %vm1640_vm1, %v1554_v9 }
 0x13d   : > { %1690 = vst.msk [vmem:[%s2484_s23 + $0x188] sm:$0xff] %vm1640_vm1, %v1608_v10  ;;  %v1478_v11 = vpop.f32.mrf.mxu0  ;;  %v1508_v12 = vpop.f32.mrf.mxu1 }
 0x13e   : > { %v1479_v13 = vadd.f32 %v2477_v29, %v1478_v11  ;;  %v1509_v16 = vadd.f32 %v2477_v29, %v1508_v12 }
 0x140   : > { %1647 = vst.msk [vmem:[%s2484_s23 + $0x30] sm:$0xff] %vm1640_vm1, %v1479_v13 }
 0x141   : > { %1657 = vst.msk [vmem:[%s2484_s23 + $0x80] sm:$0xff] %vm1640_vm1, %v1509_v16  ;;  %v1556_v18 = vpop.f32.mrf.mxu2  ;;  %v1610_v52 = vpop.f32.mrf.mxu3 }
 0x142   : > { %v1557_v19 = vadd.f32 %v2477_v29, %v1556_v18  ;;  %v1611_v20 = vadd.f32 %v2477_v29, %v1610_v52 }
 0x144   : > { %1673 = vst.msk [vmem:[%s2484_s23 + $0x100] sm:$0xff] %vm1640_vm1, %v1557_v19 }
 0x145   : > { %1691 = vst.msk [vmem:[%s2484_s23 + $0x190] sm:$0xff] %vm1640_vm1, %v1611_v20  ;;  %v1481_v21 = vpop.f32.mrf.mxu0  ;;  %v1511_v23 = vpop.f32.mrf.mxu1 }
 0x146   : > { %v1482_v24 = vadd.f32 %v2477_v29, %v1481_v21  ;;  %v1512_v25 = vadd.f32 %v2477_v29, %v1511_v23 }
 0x148   : > { %1648 = vst.msk [vmem:[%s2484_s23 + $0x38] sm:$0xff] %vm1640_vm1, %v1482_v24 }
 0x149   : > { %1658 = vst.msk [vmem:[%s2484_s23 + $0x88] sm:$0xff] %vm1640_vm1, %v1512_v25  ;;  %v1559_v17 = vpop.f32.mrf.mxu2  ;;  %v1613_v26 = vpop.f32.mrf.mxu3 }
 0x14a   : > { %v1560_v27 = vadd.f32 %v2477_v29, %v1559_v17  ;;  %v1614_v30 = vadd.f32 %v2477_v29, %v1613_v26 }
 0x14c   : > { %1674 = vst.msk [vmem:[%s2484_s23 + $0x108] sm:$0xff] %vm1640_vm1, %v1560_v27 }
 0x14d   : > { %1692 = vst.msk [vmem:[%s2484_s23 + $0x198] sm:$0xff] %vm1640_vm1, %v1614_v30  ;;  %v1484_v32 = vpop.f32.mrf.mxu0  ;;  %v1514_v33 = vpop.f32.mrf.mxu1 }
 0x14e   : > { %v1485_v31 = vadd.f32 %v2477_v29, %v1484_v32  ;;  %v1515_v34 = vadd.f32 %v2477_v29, %v1514_v33 }
 0x150   : > { %1649 = vst.msk [vmem:[%s2484_s23 + $0x40] sm:$0xff] %vm1640_vm1, %v1485_v31 }
 0x151   : > { %1659 = vst.msk [vmem:[%s2484_s23 + $0x90] sm:$0xff] %vm1640_vm1, %v1515_v34  ;;  %v1562_v35 = vpop.f32.mrf.mxu2  ;;  %v1616_v36 = vpop.f32.mrf.mxu3 }
 0x152   : > { %v1563_v37 = vadd.f32 %v2477_v29, %v1562_v35  ;;  %v1617_v38 = vadd.f32 %v2477_v29, %v1616_v36 }
 0x154   : > { %1675 = vst.msk [vmem:[%s2484_s23 + $0x110] sm:$0xff] %vm1640_vm1, %v1563_v37 }
 0x155   : > { %1693 = vst.msk [vmem:[%s2484_s23 + $0x1a0] sm:$0xff] %vm1640_vm1, %v1617_v38  ;;  %v1487_v39 = vpop.f32.mrf.mxu0  ;;  %v1517_v22 = vpop.f32.mrf.mxu1 }
 0x156   : > { %v1488_v40 = vadd.f32 %v2477_v29, %v1487_v39  ;;  %v1518_v41 = vadd.f32 %v2477_v29, %v1517_v22 }
 0x158   : > { %1650 = vst.msk [vmem:[%s2484_s23 + $0x48] sm:$0xff] %vm1640_vm1, %v1488_v40 }
 0x159   : > { %1660 = vst.msk [vmem:[%s2484_s23 + $0x98] sm:$0xff] %vm1640_vm1, %v1518_v41  ;;  %v1565_v42 = vpop.f32.mrf.mxu2  ;;  %v1619_v43 = vpop.f32.mrf.mxu3 }
 0x15a   : > { %v1566_v44 = vadd.f32 %v2477_v29, %v1565_v42  ;;  %v1620_v45 = vadd.f32 %v2477_v29, %v1619_v43 }
 0x15c   : > { %1676 = vst.msk [vmem:[%s2484_s23 + $0x118] sm:$0xff] %vm1640_vm1, %v1566_v44 }
 0x15d   : > { %1694 = vst.msk [vmem:[%s2484_s23 + $0x1a8] sm:$0xff] %vm1640_vm1, %v1620_v45  ;;  %v1490_v48 = vpop.f32.mrf.mxu0  ;;  %v1520_v15 = vpop.f32.mrf.mxu1 }
 0x15e   : > { %v1491_v47 = vadd.f32 %v2477_v29, %v1490_v48  ;;  %v1521_v50 = vadd.f32 %v2477_v29, %v1520_v15 }
 0x160   : > { %1651 = vst.msk [vmem:[%s2484_s23 + $0x50] sm:$0xff] %vm1640_vm1, %v1491_v47 }
 0x161   : > { %1661 = vst.msk [vmem:[%s2484_s23 + $0xa0] sm:$0xff] %vm1640_vm1, %v1521_v50  ;;  %v1568_v51 = vpop.f32.mrf.mxu2  ;;  %v1622_v53 = vpop.f32.mrf.mxu3 }
 0x162   : > { %v1569_v54 = vadd.f32 %v2477_v29, %v1568_v51  ;;  %v1623_v55 = vadd.f32 %v2477_v29, %v1622_v53 }
 0x164   : > { %1677 = vst.msk [vmem:[%s2484_s23 + $0x120] sm:$0xff] %vm1640_vm1, %v1569_v54 }
 0x165   : > { %1695 = vst.msk [vmem:[%s2484_s23 + $0x1b0] sm:$0xff] %vm1640_vm1, %v1623_v55  ;;  %v1493_v56 = vpop.f32.mrf.mxu0  ;;  %v1523_v57 = vpop.f32.mrf.mxu1 }
 0x166   : > { %v1494_v58 = vadd.f32 %v2477_v29, %v1493_v56  ;;  %v1524_v59 = vadd.f32 %v2477_v29, %v1523_v57 }
 0x168   : > { %1652 = vst.msk [vmem:[%s2484_s23 + $0x58] sm:$0xff] %vm1640_vm1, %v1494_v58 }
 0x169   : > { %1662 = vst.msk [vmem:[%s2484_s23 + $0xa8] sm:$0xff] %vm1640_vm1, %v1524_v59  ;;  %v1571_v60 = vpop.f32.mrf.mxu2  ;;  %v1625_v61 = vpop.f32.mrf.mxu3 }
 0x16a   : > { %v1572_v46 = vadd.f32 %v2477_v29, %v1571_v60  ;;  %v1626_v62 = vadd.f32 %v2477_v29, %v1625_v61 }
 0x16c   : > { %1678 = vst.msk [vmem:[%s2484_s23 + $0x128] sm:$0xff] %vm1640_vm1, %v1572_v46 }
 0x16d   : > { %1696 = vst.msk [vmem:[%s2484_s23 + $0x1b8] sm:$0xff] %vm1640_vm1, %v1626_v62  ;;  %v1496_v49 = vpop.f32.mrf.mxu0  ;;  %v1526_v8 = vpop.f32.mrf.mxu1 }
 0x16e   : > { %v1497_v63 = vadd.f32 %v2477_v29, %v1496_v49  ;;  %v1527_v28 = vadd.f32 %v2477_v29, %v1526_v8 }
 0x170   : > { %1653 = vst.msk [vmem:[%s2484_s23 + $0x60] sm:$0xff] %vm1640_vm1, %v1497_v63 }
 0x171   : > { %1663 = vst.msk [vmem:[%s2484_s23 + $0xb0] sm:$0xff] %vm1640_vm1, %v1527_v28  ;;  %v1574_v0 = vpop.f32.mrf.mxu2  ;;  %v1628_v1 = vpop.f32.mrf.mxu3 }
 0x172   : > { %v1575_v2 = vadd.f32 %v2477_v29, %v1574_v0  ;;  %v1629_v14 = vadd.f32 %v2477_v29, %v1628_v1 }
 0x174   : > { %1679 = vst.msk [vmem:[%s2484_s23 + $0x130] sm:$0xff] %vm1640_vm1, %v1575_v2 }
 0x175   : > { %1697 = vst.msk [vmem:[%s2484_s23 + $0x1c0] sm:$0xff] %vm1640_vm1, %v1629_v14  ;;  %v1529_v3 = vpop.f32.mrf.mxu1 }
 0x176   : > { %v1530_v4 = vadd.f32 %v2477_v29, %v1529_v3 }
 0x178   : > { %1664 = vst.msk [vmem:[%s2484_s23 + $0xb8] sm:$0xff] %vm1640_vm1, %v1530_v4 }
 0x179   : > { %v1577_v5 = vpop.f32.mrf.mxu2  ;;  %v1631_v6 = vpop.f32.mrf.mxu3 }
 0x17a   : > { %v1578_v7 = vadd.f32 %v2477_v29, %v1577_v5  ;;  %v1632_v9 = vadd.f32 %v2477_v29, %v1631_v6 }
 0x17c   : > { %1680 = vst.msk [vmem:[%s2484_s23 + $0x138] sm:$0xff] %vm1640_vm1, %v1578_v7 }
 0x17d   : > { %1698 = vst.msk [vmem:[%s2484_s23 + $0x1c8] sm:$0xff] %vm1640_vm1, %v1632_v9  ;;  %v1532_v10 = vpop.f32.mrf.mxu1 }
 0x17e   : > { %v1533_v11 = vadd.f32 %v2477_v29, %v1532_v10 }
 0x180   : > { %1665 = vst.msk [vmem:[%s2484_s23 + $0xc0] sm:$0xff] %vm1640_vm1, %v1533_v11 }
 0x181   : > { %v1580_v12 = vpop.f32.mrf.mxu2  ;;  %v1634_v13 = vpop.f32.mrf.mxu3 }
 0x182   : > { %v1581_v16 = vadd.f32 %v2477_v29, %v1580_v12  ;;  %v1635_v18 = vadd.f32 %v2477_v29, %v1634_v13 }
 0x184   : > { %1681 = vst.msk [vmem:[%s2484_s23 + $0x140] sm:$0xff] %vm1640_vm1, %v1581_v16 }
 0x185   : > { %1699 = vst.msk [vmem:[%s2484_s23 + $0x1d0] sm:$0xff] %vm1640_vm1, %v1635_v18  ;;  %v1535_v52 = vpop.f32.mrf.mxu1 }
 0x186   : > { %v1536_v19 = vadd.f32 %v2477_v29, %v1535_v52 }
 0x188   : > { %1666 = vst.msk [vmem:[%s2484_s23 + $0xc8] sm:$0xff] %vm1640_vm1, %v1536_v19 }
 0x189   : > { %v1583_v20 = vpop.f32.mrf.mxu2 }
 0x18a   : > { %v1584_v21 = vadd.f32 %v2477_v29, %v1583_v20 }
 0x18c   : > { %1682 = vst.msk [vmem:[%s2484_s23 + $0x148] sm:$0xff] %vm1640_vm1, %v1584_v21 }
 0x18d   : > { %v1538_v23 = vpop.f32.mrf.mxu1 }
 0x18e   : > { %v1539_v24 = vadd.f32 %v2477_v29, %v1538_v23 }
 0x190   : > { %1667 = vst.msk [vmem:[%s2484_s23 + $0xd0] sm:$0xff] %vm1640_vm1, %v1539_v24 }
 0x191   : > { %v1586_v25 = vpop.f32.mrf.mxu2 }
 0x192   : > { %v1587_v17 = vadd.f32 %v2477_v29, %v1586_v25 }
 0x194   : > { %1683 = vst.msk [vmem:[%s2484_s23 + $0x150] sm:$0xff] %vm1640_vm1, %v1587_v17 }
 0x195   : > { %v1541_v26 = vpop.f32.mrf.mxu1 }
 0x196   : > { %v1542_v27 = vadd.f32 %v2477_v29, %v1541_v26 }
 0x198   : > { %1668 = vst.msk [vmem:[%s2484_s23 + $0xd8] sm:$0xff] %vm1640_vm1, %v1542_v27 }
 0x199   : > { %v1589_v30 = vpop.f32.mrf.mxu2 }
 0x19a   : > { %v1590_v32 = vadd.f32 %v2477_v29, %v1589_v30 }
 0x19c   : > { %1684 = vst.msk [vmem:[%s2484_s23 + $0x158] sm:$0xff] %vm1640_vm1, %v1590_v32 }
 0x19d   : > { %v1499_v33 = vpop.f32.mrf.mxu0  ;;  %v1544_v31 = vpop.f32.mrf.mxu1 }
 0x19e   : > { %v1500_v34 = vadd.f32 %v2477_v29, %v1499_v33  ;;  %v1545_v35 = vadd.f32 %v2477_v29, %v1544_v31 }
 0x1a0   : > { %1654 = vst.msk [vmem:[%s2484_s23 + $0x68] sm:$0xff] %vm1640_vm1, %v1500_v34 }
 0x1a1   : > { %1669 = vst.msk [vmem:[%s2484_s23 + $0xe0] sm:$0xff] %vm1640_vm1, %v1545_v35  ;;  %v1592_v36 = vpop.f32.mrf.mxu2 }
 0x1a2   : > { %v1593_v37 = vadd.f32 %v2477_v29, %v1592_v36 }
 0x1a4   : > { %1685 = vst.msk [vmem:[%s2484_s23 + $0x160] sm:$0xff] %vm1640_vm1, %v1593_v37 }
 0x1a5   : > { %v1502_v38 = vpop.f32.mrf.mxu0  ;;  %v1547_v39 = vpop.f32.mrf.mxu1 }
 0x1a6   : > { %v1503_v22 = vadd.f32 %v2477_v29, %v1502_v38  ;;  %v1548_v40 = vadd.f32 %v2477_v29, %v1547_v39 }
 0x1a8   : > { %1655 = vst.msk [vmem:[%s2484_s23 + $0x70] sm:$0xff] %vm1640_vm1, %v1503_v22 }
 0x1a9   : > { %1670 = vst.msk [vmem:[%s2484_s23 + $0xe8] sm:$0xff] %vm1640_vm1, %v1548_v40 }
 0x1ac   : > { %v1637_v41 = vpop.f32.mrf.mxu3 }
 0x1ad   : > { %v1638_v42 = vadd.f32 %v2477_v29, %v1637_v41 }
 0x1af   : > { %1700 = vst.msk [vmem:[%s2484_s23 + $0x1d8] sm:$0xff] %vm1640_vm1, %v1638_v42 }
 0x1b0 PF: > { %s14_s15 = sadd.s32 1, %s1947_s15  }
 0x1b1   : > { %p11_p4 = scmp.ge.s32.totalorder %s14_s15, 4  }
 0x1b3   :  { %13 = sbr.rel (!%p11_p4) target bundleno = 1 (0x1), region = 69 }

</bundles_post_ra>
